<compile_context>
chip_gen: v7x
topology: tpu7x:2x2x1
jax: 0.10.0
libtpu: 0.0.40
codegen_flags: <defaults>
</compile_context>

<pallas_src>
import functools
import math

import jax
import jax.numpy as jnp
from jax.experimental import pallas as pl
from jax.experimental.pallas import tpu as pltpu


# ----------------------------------------------------------------------------
# Fused Pallas kernel: all CINppConv layers + readout
# ----------------------------------------------------------------------------
def cinpp_fused_kernel(x0_ref, m_ref, scale_ref,
                       w1_ref, b1_ref, w2_ref, b2_ref, wo_ref, bo_ref,
                       l1w_ref, l1b_ref, l2w_ref, l2b_ref,
                       out_ref, h_ref, *, n_true, inv_n):
    """Grid axis 0 = layer index (sequential, "arbitrary").

    x0_ref    : [Np, H]  bf16  initial features, zero-padded rows/lanes
    m_ref     : [4Np, Np] bf16 stacked adjacency (boundary/rewire/upper/lower)
    scale_ref : [1, 1, 4H] f32 per-layer (1+eps_k), replicated H times per relation
    w1_ref    : [1, 4H, 4H] bf16 block-diag first Linear of the 4 branch MLPs
    b1_ref    : [1, 1, 4H]  f32
    w2_ref    : [1, 4H, 4H] bf16 block-diag second Linear
    b2_ref    : [1, 1, 4H]  f32
    wo_ref    : [1, 4H, H]  bf16 out_mlp Linear(4H, H)
    bo_ref    : [1, 1, H]   f32
    l1w/l1b, l2w/l2b : readout linears (bf16 weights, f32 biases)
    out_ref   : [1, C] f32  logits (written on last layer only)
    h_ref     : [Np, H] bf16 persistent activation scratch
    """
    layer = pl.program_id(0)
    n_pad, hdim = h_ref.shape

    @pl.when(layer == 0)
    def _():
        h_ref[...] = x0_ref[...]

    h = h_ref[...]                                            # [Np, H] bf16

    # All four relations in one full-height MXU pass: [4Np, Np] @ [Np, H].
    agg_all = jnp.dot(m_ref[...], h,
                      preferred_element_type=jnp.float32)     # [4Np, H] f32

    # Relayout [4Np, H] -> [Np, 4H]: tile-aligned sublane slices + lane concat
    # (Np is a multiple of 128, so every slice is (8,128)-aligned).
    parts = [agg_all[k * n_pad:(k + 1) * n_pad, :] for k in range(4)]
    agg_cat = jnp.concatenate(parts, axis=-1)                 # [Np, 4H] f32

    # GIN self term as ONE lane-dense FMA: (1+eps_k)*x tiled 4x along lanes.
    h_rep = jnp.concatenate([h, h, h, h], axis=-1)            # [Np, 4H] bf16
    agg_cat = agg_cat + scale_ref[0] * h_rep                  # f32

    # Branch feature MLPs as block-diagonal weights: full K=4H MXU contractions.
    h1 = jnp.dot(agg_cat.astype(jnp.bfloat16), w1_ref[0],
                 preferred_element_type=jnp.float32) + b1_ref[0]
    h1 = jnp.maximum(h1, 0.0)                                 # [Np, 4H] f32
    h2 = jnp.dot(h1.astype(jnp.bfloat16), w2_ref[0],
                 preferred_element_type=jnp.float32) + b2_ref[0]
    h2 = jnp.maximum(h2, 0.0)                                 # [Np, 4H] f32

    # out_mlp: concat([b, r, u, l]) @ W_out  (already lane-concatenated).
    out = jnp.dot(h2.astype(jnp.bfloat16), wo_ref[0],
                  preferred_element_type=jnp.float32) + bo_ref[0]
    out = jnp.maximum(out, 0.0)   # relu inside CINppConv; outer relu idempotent
    h_ref[...] = out.astype(jnp.bfloat16)

    @pl.when(layer == pl.num_programs(0) - 1)
    def _():
        # Readout: masked global mean pool -> relu(lin1) -> lin2.
        # Padded rows are nonzero (bias+ReLU) but never reach real rows through
        # m (their columns are zero); they only need masking here.
        rows = jax.lax.broadcasted_iota(jnp.int32, (n_pad, 1), 0)
        valid = (rows < n_true).astype(jnp.float32)
        pooled = jnp.sum(out * valid, axis=0, keepdims=True) * inv_n   # [1, H]
        r1 = jnp.dot(pooled.astype(jnp.bfloat16), l1w_ref[...],
                     preferred_element_type=jnp.float32) + l1b_ref[...]
        r1 = jnp.maximum(r1, 0.0)
        out_ref[...] = jnp.dot(r1.astype(jnp.bfloat16), l2w_ref[...],
                               preferred_element_type=jnp.float32) + l2b_ref[...]


# ----------------------------------------------------------------------------
# BlockSpec helpers + pallas_call wrapper
# ----------------------------------------------------------------------------
def _const_spec(shape):
    # Grid-invariant input: constant index_map + SINGLE buffer (no re-DMA across
    # the layer axis, so double buffering would only waste VMEM).
    nd = len(shape)
    return pl.BlockSpec(tuple(shape), lambda l, _nd=nd: (0,) * _nd,
                        pipeline_mode=pl.Buffered(1))


def _layer_spec(shape):
    # Per-layer streamed input: default double buffering to hide the DMA.
    tail = tuple(shape[1:])
    nt = len(tail)
    return pl.BlockSpec((1,) + tail, lambda l, _nt=nt: (l,) + (0,) * _nt)


def _round_up(v, m):
    return ((v + m - 1) // m) * m


def cinpp_forward_fused(packed, x, edge_index, edge_type, upper_ind, lower_ind,
                        cell_dimension):
    # cell_dimension unused on the multi_dim=False path (kept for signature fidelity)
    del cell_dimension
    n_true = x.shape[0]
    hdim = packed["lin1_w"].shape[0]
    num_layers = packed["w1"].shape[0]
    num_classes = packed["lin2_b"].shape[-1]
    assert x.shape[1] <= hdim, "first-layer features must fit the hidden width"

    # Pad cell count to a multiple of 128: lane-dense aggregation matmul and
    # (8,128)-aligned sublane slices.  Padded cells have zero adjacency rows and
    # columns and are masked out of the mean pool in-kernel.
    n_pad = _round_up(max(n_true, 1), 128)

    # Dense stacked propagation matrices, built ONCE (layer-independent; the
    # (1+eps)*I self term is handled in-kernel).  Exact in bf16 (integer counts).
    m = build_adjacency(n_pad, edge_index, edge_type, upper_ind,
                        lower_ind).astype(jnp.bfloat16)            # [4Np, Np]

    # Zero-pad input features to (Np, hidden) so layer 0 shares the streamed
    # weight layout (padded lanes hit zero weight rows -> exact).  bf16 carry.
    x0 = jnp.pad(x, ((0, n_pad - n_true),
                     (0, hdim - x.shape[1]))).astype(jnp.bfloat16)

    in_specs = [
        _const_spec(x0.shape),
        _const_spec(m.shape),
        _layer_spec(packed["scale"].shape),
        _layer_spec(packed["w1"].shape),
        _layer_spec(packed["b1"].shape),
        _layer_spec(packed["w2"].shape),
        _layer_spec(packed["b2"].shape),
        _layer_spec(packed["wo"].shape),
        _layer_spec(packed["bo"].shape),
        _const_spec(packed["lin1_w"].shape),
        _const_spec(packed["lin1_b"].shape),
        _const_spec(packed["lin2_w"].shape),
        _const_spec(packed["lin2_b"].shape),
    ]

    # ---- VMEM budget (single-buffered residents + double-buffered streams) ----
    h4 = 4 * hdim
    resident = (4 * n_pad * n_pad * 2          # m (bf16, single-buffered)
                + n_pad * hdim * 2             # x0 (bf16, single-buffered)
                + n_pad * hdim * 2             # h scratch (bf16)
                + hdim * hdim * 2 + hdim * 4   # lin1
                + hdim * num_classes * 2 + num_classes * 4)   # lin2
    per_layer = 2 * (2 * h4 * h4 * 2           # w1, w2 (bf16)
                     + h4 * hdim * 2           # wo (bf16)
                     + (3 * h4 + hdim) * 4)    # scale, b1, b2, bo (f32)
    need = resident + per_layer + 2 * num_classes * 4
    vmem_limit = int(min(128 * 2**20, max(int(need * 1.5) + (2 << 20), 16 << 20)))

    # ---- cost estimate (advisory) ----
    flops = num_layers * (2 * 4 * n_pad * n_pad * hdim          # aggregation
                          + 2 * 2 * n_pad * h4 * h4             # branch MLPs
                          + 2 * n_pad * h4 * hdim)              # out_mlp
    flops += 2 * hdim * hdim + 2 * hdim * num_classes           # readout
    bytes_accessed = (4 * n_pad * n_pad * 2 + n_pad * hdim * 2
                      + per_layer // 2 * num_layers
                      + hdim * hdim * 2 + hdim * num_classes * 2
                      + num_classes * 4)

    kernel = functools.partial(cinpp_fused_kernel,
                               n_true=n_true, inv_n=1.0 / float(n_true))

    return pl.pallas_call(
        kernel,
        out_shape=jax.ShapeDtypeStruct((1, num_classes), jnp.float32),
        grid=(num_layers,),
        in_specs=in_specs,
        out_specs=pl.BlockSpec((1, num_classes), lambda l: (0, 0)),
        scratch_shapes=[pltpu.VMEM((n_pad, hdim), jnp.bfloat16)],
        compiler_params=pltpu.CompilerParams(
            dimension_semantics=("arbitrary",),      # layers carry state sequentially
            vmem_limit_bytes=vmem_limit),
        cost_estimate=pl.CostEstimate(flops=int(flops), transcendentals=0,
                                      bytes_accessed=int(bytes_accessed)),
    )(x0, m, packed["scale"],
      packed["w1"], packed["b1"], packed["w2"], packed["b2"],
      packed["wo"], packed["bo"],
      packed["lin1_w"], packed["lin1_b"], packed["lin2_w"], packed["lin2_b"])


# ----------------------------------------------------------------------------
# Plain-JAX glue: adjacency construction + parameter init / packing
# ----------------------------------------------------------------------------
# Adjacency enum values: 0=BOUNDARY, 1=REWIRE, 2=UPPER, 3=LOWER
def build_adjacency(n_pad, edge_index, edge_type, upper_ind, lower_ind):
    src, dst = edge_index[0], edge_index[1]          # PyG: messages flow src -> dst
    mats = []
    for t in range(4):
        mask = (edge_type == t).astype(jnp.float32)
        m = jnp.zeros((n_pad, n_pad), jnp.float32).at[dst, src].add(mask)
        if t == 2:   # upper: add common co-face (upper_union) contribution
            m = m + jnp.zeros((n_pad, n_pad), jnp.float32).at[dst, upper_ind].add(mask)
        if t == 3:   # lower: add common face (lower_intersection) contribution
            m = m + jnp.zeros((n_pad, n_pad), jnp.float32).at[dst, lower_ind].add(mask)
        mats.append(m)
    return jnp.concatenate(mats, axis=0)             # [4Np, Np]


def _linear(key, fan_in, fan_out):
    kw, kb = jax.random.split(key)
    bound = 1.0 / (fan_in ** 0.5)
    w = jax.random.uniform(kw, (fan_in, fan_out), jnp.float32, -bound, bound)
    b = jax.random.uniform(kb, (fan_out,), jnp.float32, -bound, bound)
    return w, b


def init_conv_params(key, din, hidden, dout):
    keys = jax.random.split(key, 9)
    w1s, b1s, w2s, b2s = [], [], [], []
    for k in range(4):   # boundary, rewire, upper, lower
        w1, b1 = _linear(keys[2 * k], din, hidden)
        w2, b2 = _linear(keys[2 * k + 1], hidden, hidden)
        w1s.append(w1); b1s.append(b1)
        w2s.append(w2); b2s.append(b2)
    wo, bo = _linear(keys[8], 4 * hidden, dout)
    return dict(w1=w1s, b1=b1s, w2=w2s, b2=b2s, wo=wo, bo=bo,
                # GINConv eps (train_eps=True, init 0) for the 4 relations
                eps=jnp.zeros((4,), jnp.float32))


def _block_diag4(mats):   # 4 x [D, H] -> [4D, 4H]
    d, h = mats[0].shape
    out = jnp.zeros((4 * d, 4 * h), mats[0].dtype)
    for k in range(4):
        out = out.at[k * d:(k + 1) * d, k * h:(k + 1) * h].set(mats[k])
    return out


def pack_params(convs, lin1_w, lin1_b, lin2_w, lin2_b, num_features, hidden):
    w1_l, b1_l, w2_l, b2_l, wo_l, bo_l, sc_l = [], [], [], [], [], [], []
    for li, c in enumerate(convs):
        w1s = c["w1"]
        if li == 0:
            # Pad layer-0 input dim (num_features -> hidden); padded input lanes
            # are zero, so the extra zero weight rows keep the math exact.
            w1s = [jnp.pad(w, ((0, hidden - w.shape[0]), (0, 0))) for w in w1s]
        w1_l.append(_block_diag4(w1s))
        b1_l.append(jnp.concatenate(c["b1"], axis=-1)[None, :])     # [1, 4H]
        w2_l.append(_block_diag4(c["w2"]))
        b2_l.append(jnp.concatenate(c["b2"], axis=-1)[None, :])     # [1, 4H]
        wo_l.append(c["wo"])                                        # [4H, H]
        bo_l.append(c["bo"][None, :])                               # [1, H]
        sc_l.append(jnp.repeat(1.0 + c["eps"], hidden)[None, :])    # [1, 4H]
    bf = lambda a: a.astype(jnp.bfloat16)
    return dict(
        w1=bf(jnp.stack(w1_l)), b1=jnp.stack(b1_l),
        w2=bf(jnp.stack(w2_l)), b2=jnp.stack(b2_l),
        wo=bf(jnp.stack(wo_l)), bo=jnp.stack(bo_l),
        scale=jnp.stack(sc_l),
        lin1_w=bf(lin1_w), lin1_b=lin1_b[None, :],
        lin2_w=bf(lin2_w), lin2_b=lin2_b[None, :],
    )


def init_cinpp_params(key, num_features, num_classes, num_layers, hidden):
    keys = jax.random.split(key, num_layers + 2)
    convs = [init_conv_params(keys[0], num_features, hidden, hidden)]
    for i in range(num_layers - 1):
        convs.append(init_conv_params(keys[i + 1], hidden, hidden, hidden))
    lin1_w, lin1_b = _linear(keys[-2], hidden, hidden)
    lin2_w, lin2_b = _linear(keys[-1], hidden, num_classes)
    return pack_params(convs, lin1_w, lin1_b, lin2_w, lin2_b, num_features, hidden)


# ----------------------------------------------------------------------------
if __name__ == "__main__":
    N_CELLS = 32
    NUM_FEATURES = 8
    HIDDEN = 32
    NUM_CLASSES = 4
    NUM_LAYERS = 2
    NUM_EDGES = 96

    root = jax.random.PRNGKey(0)
    k_param, k_x, k_src, k_dst, k_type, k_up, k_lo, k_dim = jax.random.split(root, 8)

    params = init_cinpp_params(k_param, NUM_FEATURES, NUM_CLASSES, NUM_LAYERS, HIDDEN)

    x = jax.random.normal(k_x, (N_CELLS, NUM_FEATURES), jnp.float32)
    src = jax.random.randint(k_src, (NUM_EDGES,), 0, N_CELLS, jnp.int32)
    dst = jax.random.randint(k_dst, (NUM_EDGES,), 0, N_CELLS, jnp.int32)
    edge_index = jnp.stack([src, dst])                                   # [2, E]
    edge_type = jax.random.randint(k_type, (NUM_EDGES,), 0, 4, jnp.int32)
    upper_ind = jax.random.randint(k_up, (NUM_EDGES,), 0, N_CELLS, jnp.int32)
    lower_ind = jax.random.randint(k_lo, (NUM_EDGES,), 0, N_CELLS, jnp.int32)
    cell_dimension = jax.random.randint(k_dim, (N_CELLS,), 0, 3, jnp.int32)

    @jax.jit
    def fwd(x, edge_index, edge_type, upper_ind, lower_ind, cell_dimension):
        return cinpp_forward_fused(params, x, edge_index, edge_type,
                                   upper_ind, lower_ind, cell_dimension)

    out = fwd(x, edge_index, edge_type, upper_ind, lower_ind, cell_dimension)
    out = jax.block_until_ready(out)
    assert out.shape == (1, NUM_CLASSES), out.shape
    assert bool(jnp.all(jnp.isfinite(out)))
    print("KERNEL_OK")
</pallas_src>

<mosaic_0001>
module attributes {stable_mosaic.version = 11 : i64} {
  func.func private @main(%arg0: i32) attributes {dimension_semantics = [#tpu.dimension_semantics<core_parallel>], iteration_bounds = array<i64: 2>, tpu.core_type = #tpu.core_type<sc_scalar_subcore>, window_params = []} {
    return
  }
}

module attributes {stable_mosaic.version = 11 : i64} {
  func.func private @main(%arg0: i32) attributes {dimension_semantics = [#tpu.dimension_semantics<core_parallel>], iteration_bounds = array<i64: 2>, tpu.core_type = #tpu.core_type<sc_scalar_subcore>, window_params = []} {
    return
  }
}

module attributes {stable_mosaic.version = 11 : i64} {
  func.func @cinpp_fused_kernel(%arg0: i32, %arg1: memref<128x32xbf16, #tpu.memory_space<vmem>>, %arg2: memref<512x128xbf16, #tpu.memory_space<vmem>>, %arg3: memref<1x1x128xf32, #tpu.memory_space<vmem>>, %arg4: memref<1x128x128xbf16, #tpu.memory_space<vmem>>, %arg5: memref<1x1x128xf32, #tpu.memory_space<vmem>>, %arg6: memref<1x128x128xbf16, #tpu.memory_space<vmem>>, %arg7: memref<1x1x128xf32, #tpu.memory_space<vmem>>, %arg8: memref<1x128x32xbf16, #tpu.memory_space<vmem>>, %arg9: memref<1x1x32xf32, #tpu.memory_space<vmem>>, %arg10: memref<32x32xbf16, #tpu.memory_space<vmem>>, %arg11: memref<1x32xf32, #tpu.memory_space<vmem>>, %arg12: memref<32x4xbf16, #tpu.memory_space<vmem>>, %arg13: memref<1x4xf32, #tpu.memory_space<vmem>>, %arg14: memref<1x4xf32, #tpu.memory_space<vmem>>, %arg15: memref<128x32xbf16, #tpu.memory_space<vmem>>) attributes {dimension_semantics = [#tpu.dimension_semantics<arbitrary>], iteration_bounds = array<i64: 2>, scalar_prefetch = 0 : i64, scratch_operands = 1 : i64, tpu.core_type = #tpu.core_type<tc>, window_params = [{pipeline_mode = #tpu.pipeline_mode<synchronous>, transform_indices = @transform_0, window_bounds = array<i64: 128, 32>}, {pipeline_mode = #tpu.pipeline_mode<synchronous>, transform_indices = @transform_1, window_bounds = array<i64: 512, 128>}, {transform_indices = @transform_2, window_bounds = array<i64: 1, 1, 128>}, {transform_indices = @transform_3, window_bounds = array<i64: 1, 128, 128>}, {transform_indices = @transform_4, window_bounds = array<i64: 1, 1, 128>}, {transform_indices = @transform_5, window_bounds = array<i64: 1, 128, 128>}, {transform_indices = @transform_6, window_bounds = array<i64: 1, 1, 128>}, {transform_indices = @transform_7, window_bounds = array<i64: 1, 128, 32>}, {transform_indices = @transform_8, window_bounds = array<i64: 1, 1, 32>}, {pipeline_mode = #tpu.pipeline_mode<synchronous>, transform_indices = @transform_9, window_bounds = array<i64: 32, 32>}, {pipeline_mode = #tpu.pipeline_mode<synchronous>, transform_indices = @transform_10, window_bounds = array<i64: 1, 32>}, {pipeline_mode = #tpu.pipeline_mode<synchronous>, transform_indices = @transform_11, window_bounds = array<i64: 32, 4>}, {pipeline_mode = #tpu.pipeline_mode<synchronous>, transform_indices = @transform_12, window_bounds = array<i64: 1, 4>}, {pipeline_mode = #tpu.pipeline_mode<synchronous>, transform_indices = @transform_13, window_bounds = array<i64: 1, 4>}]} {
    %c0_i32 = arith.constant 0 : i32
    %0 = arith.cmpi eq, %arg0, %c0_i32 : i32
    %1 = arith.extui %0 : i1 to i32
    %c0_i32_0 = arith.constant 0 : i32
    %2 = arith.cmpi ne, %1, %c0_i32_0 : i32
    scf.if %2 {
      %c0_34 = arith.constant 0 : index
      %c0_35 = arith.constant 0 : index
      %53 = vector.load %arg1[%c0_34, %c0_35] : memref<128x32xbf16, #tpu.memory_space<vmem>>, vector<128x32xbf16>
      %c0_36 = arith.constant 0 : index
      %c0_37 = arith.constant 0 : index
      %54 = vector.load %arg15[%c0_36, %c0_37] : memref<128x32xbf16, #tpu.memory_space<vmem>>, vector<128x32xbf16>
      tpu.vector_store %arg15[%c0_36, %c0_37], %53 {strides = array<i32>} : memref<128x32xbf16, #tpu.memory_space<vmem>>, vector<128x32xbf16>,
    } else {
    }
    %c0 = arith.constant 0 : index
    %c0_1 = arith.constant 0 : index
    %3 = vector.load %arg15[%c0, %c0_1] : memref<128x32xbf16, #tpu.memory_space<vmem>>, vector<128x32xbf16>
    %c0_2 = arith.constant 0 : index
    %c0_3 = arith.constant 0 : index
    %4 = vector.load %arg2[%c0_2, %c0_3] : memref<512x128xbf16, #tpu.memory_space<vmem>>, vector<512x128xbf16>
    %cst = arith.constant dense<0.000000e+00> : vector<512x32xf32>
    %5 = tpu.matmul %4, %3, %cst {dimension_numbers = #tpu.dot_dimension_numbers<[1], [0], [0], [1], [0, 0, 1, 1], [], []>} : vector<512x128xbf16>, vector<128x32xbf16>, vector<512x32xf32> -> vector<512x32xf32>
    %6 = vector.extract_strided_slice %5 {offsets = [0, 0], sizes = [128, 32], strides = [1, 1]} : vector<512x32xf32> to vector<128x32xf32>
    %7 = vector.extract_strided_slice %5 {offsets = [128, 0], sizes = [128, 32], strides = [1, 1]} : vector<512x32xf32> to vector<128x32xf32>
    %8 = vector.extract_strided_slice %5 {offsets = [256, 0], sizes = [128, 32], strides = [1, 1]} : vector<512x32xf32> to vector<128x32xf32>
    %9 = vector.extract_strided_slice %5 {offsets = [384, 0], sizes = [128, 32], strides = [1, 1]} : vector<512x32xf32> to vector<128x32xf32>
    %10 = tpu.concatenate %6, %7, %8, %9 in 1 : vector<128x32xf32>, vector<128x32xf32>, vector<128x32xf32>, vector<128x32xf32> -> vector<128x128xf32>
    %11 = tpu.concatenate %3, %3, %3, %3 in 1 : vector<128x32xbf16>, vector<128x32xbf16>, vector<128x32xbf16>, vector<128x32xbf16> -> vector<128x128xbf16>
    %c0_4 = arith.constant 0 : index
    %c0_5 = arith.constant 0 : index
    %c0_6 = arith.constant 0 : index
    %12 = vector.load %arg3[%c0_4, %c0_5, %c0_6] : memref<1x1x128xf32, #tpu.memory_space<vmem>>, vector<1x1x128xf32>
    %13 = vector.shape_cast %12 : vector<1x1x128xf32> to vector<1x128xf32>
    %14 = arith.extf %11 : vector<128x128xbf16> to vector<128x128xf32>
    %15 = vector.broadcast %13 : vector<1x128xf32> to vector<128x128xf32>
    %16 = arith.mulf %15, %14 : vector<128x128xf32>
    %17 = arith.addf %10, %16 : vector<128x128xf32>
    %18 = arith.truncf %17 : vector<128x128xf32> to vector<128x128xbf16>
    %c0_7 = arith.constant 0 : index
    %c0_8 = arith.constant 0 : index
    %c0_9 = arith.constant 0 : index
    %19 = vector.load %arg4[%c0_7, %c0_8, %c0_9] : memref<1x128x128xbf16, #tpu.memory_space<vmem>>, vector<1x128x128xbf16>
    %20 = vector.shape_cast %19 : vector<1x128x128xbf16> to vector<128x128xbf16>
    %cst_10 = arith.constant dense<0.000000e+00> : vector<128x128xf32>
    %21 = tpu.matmul %18, %20, %cst_10 {dimension_numbers = #tpu.dot_dimension_numbers<[1], [0], [0], [1], [0, 0, 1, 1], [], []>} : vector<128x128xbf16>, vector<128x128xbf16>, vector<128x128xf32> -> vector<128x128xf32>
    %c0_11 = arith.constant 0 : index
    %c0_12 = arith.constant 0 : index
    %c0_13 = arith.constant 0 : index
    %22 = vector.load %arg5[%c0_11, %c0_12, %c0_13] : memref<1x1x128xf32, #tpu.memory_space<vmem>>, vector<1x1x128xf32>
    %23 = vector.shape_cast %22 : vector<1x1x128xf32> to vector<1x128xf32>
    %24 = vector.broadcast %23 : vector<1x128xf32> to vector<128x128xf32>
    %25 = arith.addf %21, %24 : vector<128x128xf32>
    %cst_14 = arith.constant 0.000000e+00 : f32
    %26 = vector.broadcast %cst_14 : f32 to vector<128x128xf32>
    %27 = arith.maximumf %25, %26 : vector<128x128xf32>
    %28 = arith.truncf %27 : vector<128x128xf32> to vector<128x128xbf16>
    %c0_15 = arith.constant 0 : index
    %c0_16 = arith.constant 0 : index
    %c0_17 = arith.constant 0 : index
    %29 = vector.load %arg6[%c0_15, %c0_16, %c0_17] : memref<1x128x128xbf16, #tpu.memory_space<vmem>>, vector<1x128x128xbf16>
    %30 = vector.shape_cast %29 : vector<1x128x128xbf16> to vector<128x128xbf16>
    %cst_18 = arith.constant dense<0.000000e+00> : vector<128x128xf32>
    %31 = tpu.matmul %28, %30, %cst_18 {dimension_numbers = #tpu.dot_dimension_numbers<[1], [0], [0], [1], [0, 0, 1, 1], [], []>} : vector<128x128xbf16>, vector<128x128xbf16>, vector<128x128xf32> -> vector<128x128xf32>
    %c0_19 = arith.constant 0 : index
    %c0_20 = arith.constant 0 : index
    %c0_21 = arith.constant 0 : index
    %32 = vector.load %arg7[%c0_19, %c0_20, %c0_21] : memref<1x1x128xf32, #tpu.memory_space<vmem>>, vector<1x1x128xf32>
    %33 = vector.shape_cast %32 : vector<1x1x128xf32> to vector<1x128xf32>
    %34 = vector.broadcast %33 : vector<1x128xf32> to vector<128x128xf32>
    %35 = arith.addf %31, %34 : vector<128x128xf32>
    %cst_22 = arith.constant 0.000000e+00 : f32
    %36 = vector.broadcast %cst_22 : f32 to vector<128x128xf32>
    %37 = arith.maximumf %35, %36 : vector<128x128xf32>
    %38 = arith.truncf %37 : vector<128x128xf32> to vector<128x128xbf16>
    %c0_23 = arith.constant 0 : index
    %c0_24 = arith.constant 0 : index
    %c0_25 = arith.constant 0 : index
    %39 = vector.load %arg8[%c0_23, %c0_24, %c0_25] : memref<1x128x32xbf16, #tpu.memory_space<vmem>>, vector<1x128x32xbf16>
    %40 = vector.shape_cast %39 : vector<1x128x32xbf16> to vector<128x32xbf16>
    %cst_26 = arith.constant dense<0.000000e+00> : vector<128x32xf32>
    %41 = tpu.matmul %38, %40, %cst_26 {dimension_numbers = #tpu.dot_dimension_numbers<[1], [0], [0], [1], [0, 0, 1, 1], [], []>} : vector<128x128xbf16>, vector<128x32xbf16>, vector<128x32xf32> -> vector<128x32xf32>
    %c0_27 = arith.constant 0 : index
    %c0_28 = arith.constant 0 : index
    %c0_29 = arith.constant 0 : index
    %42 = vector.load %arg9[%c0_27, %c0_28, %c0_29] : memref<1x1x32xf32, #tpu.memory_space<vmem>>, vector<1x1x32xf32>
    %43 = vector.shape_cast %42 : vector<1x1x32xf32> to vector<1x32xf32>
    %44 = vector.broadcast %43 : vector<1x32xf32> to vector<128x32xf32>
    %45 = arith.addf %41, %44 : vector<128x32xf32>
    %cst_30 = arith.constant 0.000000e+00 : f32
    %46 = vector.broadcast %cst_30 : f32 to vector<128x32xf32>
    %47 = arith.maximumf %45, %46 : vector<128x32xf32>
    %48 = arith.truncf %47 : vector<128x32xf32> to vector<128x32xbf16>
    %c0_31 = arith.constant 0 : index
    %c0_32 = arith.constant 0 : index
    %49 = vector.load %arg15[%c0_31, %c0_32] : memref<128x32xbf16, #tpu.memory_space<vmem>>, vector<128x32xbf16>
    tpu.vector_store %arg15[%c0_31, %c0_32], %48 {strides = array<i32>} : memref<128x32xbf16, #tpu.memory_space<vmem>>, vector<128x32xbf16>,
    %c1_i32 = arith.constant 1 : i32
    %50 = arith.cmpi eq, %arg0, %c1_i32 : i32
    %51 = arith.extui %50 : i1 to i32
    %c0_i32_33 = arith.constant 0 : i32
    %52 = arith.cmpi ne, %51, %c0_i32_33 : i32
    scf.if %52 {
      %53 = tpu.iota {dimensions = array<i32: 0>} : vector<128x1xi32>
      %c32_i32 = arith.constant 32 : i32
      %54 = vector.broadcast %c32_i32 : i32 to vector<128x1xi32>
      %55 = arith.cmpi slt, %53, %54 : vector<128x1xi32>
      %56 = arith.extui %55 : vector<128x1xi1> to vector<128x1xi32>
      %57 = arith.sitofp %56 : vector<128x1xi32> to vector<128x1xf32>
      %58 = vector.broadcast %57 : vector<128x1xf32> to vector<128x32xf32>
      %59 = arith.mulf %47, %58 : vector<128x32xf32>
      %cst_34 = arith.constant dense<0.000000e+00> : vector<32xf32>
      %60 = vector.multi_reduction <add>, %59, %cst_34 [0] : vector<128x32xf32> to vector<32xf32>
      %61 = vector.shape_cast %60 : vector<32xf32> to vector<1x32xf32>
      %cst_35 = arith.constant 3.125000e-02 : f32
      %62 = vector.broadcast %cst_35 : f32 to vector<1x32xf32>
      %63 = arith.mulf %61, %62 : vector<1x32xf32>
      %64 = arith.truncf %63 : vector<1x32xf32> to vector<1x32xbf16>
      %c0_36 = arith.constant 0 : index
      %c0_37 = arith.constant 0 : index
      %65 = vector.load %arg10[%c0_36, %c0_37] : memref<32x32xbf16, #tpu.memory_space<vmem>>, vector<32x32xbf16>
      %cst_38 = arith.constant dense<0.000000e+00> : vector<1x32xf32>
      %66 = tpu.matmul %64, %65, %cst_38 {dimension_numbers = #tpu.dot_dimension_numbers<[1], [0], [0], [1], [0, 0, 1, 1], [], []>} : vector<1x32xbf16>, vector<32x32xbf16>, vector<1x32xf32> -> vector<1x32xf32>
      %c0_39 = arith.constant 0 : index
      %c0_40 = arith.constant 0 : index
      %67 = vector.load %arg11[%c0_39, %c0_40] : memref<1x32xf32, #tpu.memory_space<vmem>>, vector<1x32xf32>
      %68 = arith.addf %66, %67 : vector<1x32xf32>
      %cst_41 = arith.constant 0.000000e+00 : f32
      %69 = vector.broadcast %cst_41 : f32 to vector<1x32xf32>
      %70 = arith.maximumf %68, %69 : vector<1x32xf32>
      %71 = arith.truncf %70 : vector<1x32xf32> to vector<1x32xbf16>
      %c0_42 = arith.constant 0 : index
      %c0_43 = arith.constant 0 : index
      %72 = vector.load %arg12[%c0_42, %c0_43] : memref<32x4xbf16, #tpu.memory_space<vmem>>, vector<32x4xbf16>
      %cst_44 = arith.constant dense<0.000000e+00> : vector<1x4xf32>
      %73 = tpu.matmul %71, %72, %cst_44 {dimension_numbers = #tpu.dot_dimension_numbers<[1], [0], [0], [1], [0, 0, 1, 1], [], []>} : vector<1x32xbf16>, vector<32x4xbf16>, vector<1x4xf32> -> vector<1x4xf32>
      %c0_45 = arith.constant 0 : index
      %c0_46 = arith.constant 0 : index
      %74 = vector.load %arg13[%c0_45, %c0_46] : memref<1x4xf32, #tpu.memory_space<vmem>>, vector<1x4xf32>
      %75 = arith.addf %73, %74 : vector<1x4xf32>
      %c0_47 = arith.constant 0 : index
      %c0_48 = arith.constant 0 : index
      %76 = vector.load %arg14[%c0_47, %c0_48] : memref<1x4xf32, #tpu.memory_space<vmem>>, vector<1x4xf32>
      tpu.vector_store %arg14[%c0_47, %c0_48], %75 {strides = array<i32>} : memref<1x4xf32, #tpu.memory_space<vmem>>, vector<1x4xf32>,
    } else {
    }
    return
  }
  func.func @transform_0(%arg0: i32) -> (i32, i32) {
    %c0_i32 = arith.constant 0 : i32
    %c0_i32_0 = arith.constant 0 : i32
    %c0_i32_1 = arith.constant 0 : i32
    return %c0_i32, %c0_i32_0 : i32, i32
  }
  func.func @transform_1(%arg0: i32) -> (i32, i32) {
    %c0_i32 = arith.constant 0 : i32
    %c0_i32_0 = arith.constant 0 : i32
    %c0_i32_1 = arith.constant 0 : i32
    return %c0_i32, %c0_i32_0 : i32, i32
  }
  func.func @transform_2(%arg0: i32) -> (i32, i32, i32) {
    %c0_i32 = arith.constant 0 : i32
    %c0_i32_0 = arith.constant 0 : i32
    %c0_i32_1 = arith.constant 0 : i32
    return %arg0, %c0_i32, %c0_i32_0 : i32, i32, i32
  }
  func.func @transform_3(%arg0: i32) -> (i32, i32, i32) {
    %c0_i32 = arith.constant 0 : i32
    %c0_i32_0 = arith.constant 0 : i32
    %c0_i32_1 = arith.constant 0 : i32
    return %arg0, %c0_i32, %c0_i32_0 : i32, i32, i32
  }
  func.func @transform_4(%arg0: i32) -> (i32, i32, i32) {
    %c0_i32 = arith.constant 0 : i32
    %c0_i32_0 = arith.constant 0 : i32
    %c0_i32_1 = arith.constant 0 : i32
    return %arg0, %c0_i32, %c0_i32_0 : i32, i32, i32
  }
  func.func @transform_5(%arg0: i32) -> (i32, i32, i32) {
    %c0_i32 = arith.constant 0 : i32
    %c0_i32_0 = arith.constant 0 : i32
    %c0_i32_1 = arith.constant 0 : i32
    return %arg0, %c0_i32, %c0_i32_0 : i32, i32, i32
  }
  func.func @transform_6(%arg0: i32) -> (i32, i32, i32) {
    %c0_i32 = arith.constant 0 : i32
    %c0_i32_0 = arith.constant 0 : i32
    %c0_i32_1 = arith.constant 0 : i32
    return %arg0, %c0_i32, %c0_i32_0 : i32, i32, i32
  }
  func.func @transform_7(%arg0: i32) -> (i32, i32, i32) {
    %c0_i32 = arith.constant 0 : i32
    %c0_i32_0 = arith.constant 0 : i32
    %c0_i32_1 = arith.constant 0 : i32
    return %arg0, %c0_i32, %c0_i32_0 : i32, i32, i32
  }
  func.func @transform_8(%arg0: i32) -> (i32, i32, i32) {
    %c0_i32 = arith.constant 0 : i32
    %c0_i32_0 = arith.constant 0 : i32
    %c0_i32_1 = arith.constant 0 : i32
    return %arg0, %c0_i32, %c0_i32_0 : i32, i32, i32
  }
  func.func @transform_9(%arg0: i32) -> (i32, i32) {
    %c0_i32 = arith.constant 0 : i32
    %c0_i32_0 = arith.constant 0 : i32
    %c0_i32_1 = arith.constant 0 : i32
    return %c0_i32, %c0_i32_0 : i32, i32
  }
  func.func @transform_10(%arg0: i32) -> (i32, i32) {
    %c0_i32 = arith.constant 0 : i32
    %c0_i32_0 = arith.constant 0 : i32
    %c0_i32_1 = arith.constant 0 : i32
    return %c0_i32, %c0_i32_0 : i32, i32
  }
  func.func @transform_11(%arg0: i32) -> (i32, i32) {
    %c0_i32 = arith.constant 0 : i32
    %c0_i32_0 = arith.constant 0 : i32
    %c0_i32_1 = arith.constant 0 : i32
    return %c0_i32, %c0_i32_0 : i32, i32
  }
  func.func @transform_12(%arg0: i32) -> (i32, i32) {
    %c0_i32 = arith.constant 0 : i32
    %c0_i32_0 = arith.constant 0 : i32
    %c0_i32_1 = arith.constant 0 : i32
    return %c0_i32, %c0_i32_0 : i32, i32
  }
  func.func @transform_13(%arg0: i32) -> (i32, i32) {
    %c0_i32 = arith.constant 0 : i32
    %c0_i32_0 = arith.constant 0 : i32
    %c0_i32_1 = arith.constant 0 : i32
    return %c0_i32, %c0_i32_0 : i32, i32
  }
}

</mosaic_0001>

<bundles_post_ra>
// kernel: fwd.1
= control target key start
LH: loop header
LB: loop body
LE: loop exit
PB: predicated region body
PF: predicated region fallthrough
CT: control target
= control target key end

     0   :  { %s3817_s0 = inlined_call_operand.vmem [shape: bf16[128,32], index: 0, kind: input, shape index: {}]   ;;  %s3818_s1 = inlined_call_operand.vmem [shape: bf16[512,128], index: 1, kind: input, shape index: {}]   ;;  %s3819_s2 = inlined_call_operand.vmem [shape: f32[2,1,128], index: 2, kind: input, shape index: {}]   ;;  %s3820_s3 = inlined_call_operand.vmem [shape: bf16[2,128,128], index: 3, kind: input, shape index: {}]   ;;  %s3821_s4 = inlined_call_operand.vmem [shape: f32[2,1,128], index: 4, kind: input, shape index: {}]   ;;  %s3822_s5 = inlined_call_operand.vmem [shape: bf16[2,128,128], index: 5, kind: input, shape index: {}]   ;;  %s3823_s6 = inlined_call_operand.vmem [shape: f32[2,1,128], index: 6, kind: input, shape index: {}]   ;;  %s3824_s7 = inlined_call_operand.vmem [shape: bf16[2,128,32], index: 7, kind: input, shape index: {}]   ;;  %s3825_s8 = inlined_call_operand.vmem [shape: f32[2,1,32], index: 8, kind: input, shape index: {}]   ;;  %s3826_s9 = inlined_call_operand.vmem [shape: bf16[32,32], index: 9, kind: input, shape index: {}]   ;;  %s3827_s10 = inlined_call_operand.vmem [shape: f32[1,32], index: 10, kind: input, shape index: {}]   ;;  %s3828_s11 = inlined_call_operand.vmem [shape: bf16[32,4], index: 11, kind: input, shape index: {}]   ;;  %s3829_s12 = inlined_call_operand.vmem [shape: f32[1,4], index: 12, kind: input, shape index: {}]   ;;  %s3830_s13 = inlined_call_operand.hbm [shape: f32[1,4], index: 13, kind: output, shape index: {}]  }
   0x1   :  { %3833 = sst [smem:[#allocation12_spill]] %s3820_s3 }
   0x2   :  { %3834 = sst [smem:[#allocation13_spill]] %s3830_s13 }
   0x3   :  { %18 = vsyncpa [#allocation4], 0  ;;  %s3099_s25 = smov 0  }
   0x4 LB: > { %3835 = sst [smem:[#allocation6_spill]] %s3021_s25  ;;  %s3105_s26 = sadd.s32 4294967295, %s3021_s25   ;;  %s3021_s25 = sphi %s3099_s25, %s24_s25  }
   0x5   : > { %p2521_p0 = scmp.ge.s32.totalorder %s3021_s25, 1  ;;  %p435_p1 = scmp.lt.s32.totalorder %s3021_s25, 3 }
   0x7   : > { %p436_p2 = pnand %p2521_p0, %p435_p1 }
   0x9   : > { %439 = sbr.rel (%p436_p2) target bundleno = 1691 (0x69b), region = 72 }
  0x10   : > { %p496_p3 = scmp.lt.s32.totalorder %s3105_s26, 1  ;;  %s3836_s3 = sld [smem:[#allocation12_spill]] }
  0x11   : > { %p2528_p4 = scmp.ne.s32.totalorder %s3105_s26, 0 }
  0x12   : > { %s3111_s27 = scalar_select %p496_p3, %s3105_s26, 1 }
  0x13   : > { %527 = sbr.rel (%p2528_p4) target bundleno = 26 (0x1a), region = 76  ;;  %v2917_v0 = vld [vmem:[%s3817_s0] sm:$0xff] (!%p2528_p4)   ;;  %vm592_vm0 = vcmask (!%p2528_p4), 261120   ;;  %v2918_v1 = vld [vmem:[%s3817_s0 + $0x8] sm:$0xff] (!%p2528_p4)   ;;  %v2919_v2 = vld [vmem:[%s3817_s0 + $0x10] sm:$0xff] (!%p2528_p4)  }
  0x14   : > { %s2608_s14 = sshll.u32 %s3111_s27, 6  ;;  %s506_s20 = scalar_lea.vmem %s3821_s4, %s3111_s27  ;;  %593 = vst.msk [vmem:[#allocation2] sm:$0xff] (!%p2528_p4), %vm592_vm0, %v2917_v0  ;;  %594 = vst.msk [vmem:[#allocation2 + $0x8] sm:$0xff] (!%p2528_p4), %vm592_vm0, %v2918_v1  ;;  %v2920_v3 = vld [vmem:[%s3817_s0 + $0x18] sm:$0xff] (!%p2528_p4)   ;;  %v2921_v4 = vld [vmem:[%s3817_s0 + $0x20] sm:$0xff] (!%p2528_p4)  }
  0x15   : > { %s3130_s23 = scalar_lea.vmem %s3822_s5, %s2608_s14  ;;  %s3139_s13 = scalar_lea.vmem %s3824_s7, %s2608_s14  ;;  %595 = vst.msk [vmem:[#allocation2 + $0x10] sm:$0xff] (!%p2528_p4), %vm592_vm0, %v2919_v2  ;;  %596 = vst.msk [vmem:[#allocation2 + $0x18] sm:$0xff] (!%p2528_p4), %vm592_vm0, %v2920_v3  ;;  %v2922_v5 = vld [vmem:[%s3817_s0 + $0x28] sm:$0xff] (!%p2528_p4)   ;;  %v2923_v6 = vld [vmem:[%s3817_s0 + $0x30] sm:$0xff] (!%p2528_p4)  }
  0x16   : > { %s3121_s17 = scalar_lea.vmem %s3836_s3, %s2608_s14  ;;  %597 = vst.msk [vmem:[#allocation2 + $0x20] sm:$0xff] (!%p2528_p4), %vm592_vm0, %v2921_v4  ;;  %598 = vst.msk [vmem:[#allocation2 + $0x28] sm:$0xff] (!%p2528_p4), %vm592_vm0, %v2922_v5  ;;  %v2924_v7 = vld [vmem:[%s3817_s0 + $0x38] sm:$0xff] (!%p2528_p4)  }
  0x17   : > { %599 = vst.msk [vmem:[#allocation2 + $0x30] sm:$0xff] (!%p2528_p4), %vm592_vm0, %v2923_v6  ;;  %600 = vst.msk [vmem:[#allocation2 + $0x38] sm:$0xff] (!%p2528_p4), %vm592_vm0, %v2924_v7 }
  0x1a PF: > { %v2925_v10 = vld [vmem:[%s3818_s1] sm:$0xff]   ;;  %s3023_s24 = smov 32   ;;  %s3024_s28 = smov 64   ;;  %v2926_v17 = vld [vmem:[%s3818_s1 + $0x8] sm:$0xff]   ;;  %v2927_v18 = vld [vmem:[%s3818_s1 + $0x10] sm:$0xff]   ;;  %vm1346_vm1 = vcmask 261120  }
  0x1b   : > { %v3170_v8 = vld [vmem:[#allocation2] sm:$0xff]  ;;  %v3172_v9 = vld [vmem:[#allocation2 + $0x8] sm:$0xff]  ;;  %2721 = vmatprep.mubr.bf16.mxu0 %v2925_v10  ;;  %s3025_s21 = smov 96   ;;  %v2928_v19 = vld [vmem:[%s3818_s1 + $0x18] sm:$0xff]   ;;  %vm1363_vm2 = vcmask 523264   ;;  %vm1380_vm3 = vcmask 785408   ;;  %s3848_s29 = scalar_lea.vmem %s3823_s6, %s3111_s27 }
  0x1c   : > { %2705 = vmatprep.subr.bf16.mxu0 %v3170_v8  ;;  %v3180_v11 = vld [vmem:[#allocation2 + $0x10] sm:$0xff]  ;;  %v3184_v12 = vld [vmem:[#allocation2 + $0x18] sm:$0xff]  ;;  %1405 = vrot.lane.b32.xlu0 %v3170_v8, %s3023_s24  ;;  %v2929_v20 = vld [vmem:[%s3818_s1 + $0x20] sm:$0xff]   ;;  %s3849_s16 = scalar_lea.vmem %s3825_s8, %s3111_s27  ;;  %p2597_p5 = scmp.ne.s32.totalorder %s3105_s26, 1 }
  0x1d   : > { %2706 = vmatpush3.bf16.msra.mxu0 %v3170_v8  ;;  %v3188_v13 = vld [vmem:[#allocation2 + $0x20] sm:$0xff]  ;;  %v3192_v14 = vld [vmem:[#allocation2 + $0x28] sm:$0xff]  ;;  %1421 = vrot.lane.b32.xlu1 %v3170_v8, %s3024_s28  ;;  %v2931_v22 = vld [vmem:[%s3818_s1 + $0x30] sm:$0xff]   ;;  %vm3027_vm4 = vmmov (!%p2597_p5), 0   ;;  %vm2410_vm5 = vcmask (!%p2597_p5), 24576  }
  0x1e   : > { %2707 = vmatprep.subr.bf16.mxu0 %v3172_v9  ;;  %v3196_v15 = vld [vmem:[#allocation2 + $0x30] sm:$0xff]  ;;  %v3200_v16 = vld [vmem:[#allocation2 + $0x38] sm:$0xff]  ;;  %v2930_v21 = vld [vmem:[%s3818_s1 + $0x28] sm:$0xff]  }
  0x1f   : > { %v2932_v23 = vld [vmem:[%s3818_s1 + $0x38] sm:$0xff]   ;;  %v2933_v24 = vld [vmem:[%s3818_s1 + $0x40] sm:$0xff]   ;;  %v2934_v25 = vld [vmem:[%s3818_s1 + $0x48] sm:$0xff]  }
  0x20   : > { %1407 = vrot.lane.b32.xlu0 %v3172_v9, %s3023_s24  ;;  %v2935_v26 = vld [vmem:[%s3818_s1 + $0x50] sm:$0xff]   ;;  %v2936_v27 = vld [vmem:[%s3818_s1 + $0x58] sm:$0xff]   ;;  %v2937_v28 = vld [vmem:[%s3818_s1 + $0x60] sm:$0xff]  }
  0x21   : > { %2708 = vmatpush3.bf16.msra.mxu0 %v3172_v9  ;;  %1423 = vrot.lane.b32.xlu1 %v3172_v9, %s3024_s28  ;;  %v2938_v29 = vld [vmem:[%s3818_s1 + $0x68] sm:$0xff]   ;;  %v2939_v30 = vld [vmem:[%s3818_s1 + $0x70] sm:$0xff]   ;;  %v2940_v31 = vld [vmem:[%s3818_s1 + $0x78] sm:$0xff]  }
  0x22   : > { %2709 = vmatprep.subr.bf16.mxu0 %v3180_v11  ;;  %v2941_v32 = vld [vmem:[%s3818_s1 + $0x80] sm:$0xff]   ;;  %v2942_v33 = vld [vmem:[%s3818_s1 + $0x88] sm:$0xff]   ;;  %v2943_v34 = vld [vmem:[%s3818_s1 + $0x90] sm:$0xff]  }
  0x23   : > { %v2944_v35 = vld [vmem:[%s3818_s1 + $0x98] sm:$0xff]   ;;  %v2945_v36 = vld [vmem:[%s3818_s1 + $0xa0] sm:$0xff]   ;;  %v2946_v37 = vld [vmem:[%s3818_s1 + $0xa8] sm:$0xff]  }
  0x24   : > { %1437 = vrot.lane.b32.xlu0 %v3170_v8, %s3025_s21  ;;  %v2947_v38 = vld [vmem:[%s3818_s1 + $0xb0] sm:$0xff]   ;;  %v2948_v39 = vld [vmem:[%s3818_s1 + $0xb8] sm:$0xff]   ;;  %v2949_v40 = vld [vmem:[%s3818_s1 + $0xc0] sm:$0xff]  }
  0x25   : > { %2710 = vmatpush3.bf16.msra.mxu0 %v3180_v11  ;;  %1439 = vrot.lane.b32.xlu1 %v3172_v9, %s3025_s21  ;;  %v2950_v41 = vld [vmem:[%s3818_s1 + $0xc8] sm:$0xff]   ;;  %v2951_v42 = vld [vmem:[%s3818_s1 + $0xd0] sm:$0xff]   ;;  %v2952_v43 = vld [vmem:[%s3818_s1 + $0xd8] sm:$0xff]  }
  0x26   : > { %2711 = vmatprep.subr.bf16.mxu0 %v3184_v12  ;;  %v2953_v44 = vld [vmem:[%s3818_s1 + $0xe0] sm:$0xff]   ;;  %v2954_v45 = vld [vmem:[%s3818_s1 + $0xe8] sm:$0xff]   ;;  %v2955_v46 = vld [vmem:[%s3818_s1 + $0xf0] sm:$0xff]  }
  0x27   : > { %v2956_v47 = vld [vmem:[%s3818_s1 + $0xf8] sm:$0xff]  }
  0x28   : > { %1409 = vrot.lane.b32.xlu0 %v3180_v11, %s3023_s24 }
  0x29   : > { %2712 = vmatpush3.bf16.msra.mxu0 %v3184_v12  ;;  %1411 = vrot.lane.b32.xlu1 %v3184_v12, %s3023_s24 }
  0x2a   : > { %2713 = vmatprep.subr.bf16.mxu0 %v3188_v13 }
  0x2c   : > { %1425 = vrot.lane.b32.xlu0 %v3180_v11, %s3024_s28 }
  0x2d   : > { %2714 = vmatpush3.bf16.msra.mxu0 %v3188_v13  ;;  %1427 = vrot.lane.b32.xlu1 %v3184_v12, %s3024_s28 }
  0x2e   : > { %2715 = vmatprep.subr.bf16.mxu0 %v3192_v14 }
  0x30   : > { %1441 = vrot.lane.b32.xlu0 %v3180_v11, %s3025_s21 }
  0x31   : > { %2716 = vmatpush3.bf16.msra.mxu0 %v3192_v14  ;;  %1443 = vrot.lane.b32.xlu1 %v3184_v12, %s3025_s21 }
  0x32   : > { %2717 = vmatprep.subr.bf16.mxu0 %v3196_v15 }
  0x34   : > { %1413 = vrot.lane.b32.xlu0 %v3188_v13, %s3023_s24 }
  0x35   : > { %2718 = vmatpush3.bf16.msra.mxu0 %v3196_v15  ;;  %1415 = vrot.lane.b32.xlu1 %v3192_v14, %s3023_s24 }
  0x36   : > { %2719 = vmatprep.subr.bf16.mxu0 %v3200_v16 }
  0x38   : > { %1429 = vrot.lane.b32.xlu0 %v3188_v13, %s3024_s28 }
  0x39   : > { %2720 = vmatpush3.bf16.msra.mxu0 %v3200_v16  ;;  %1431 = vrot.lane.b32.xlu1 %v3192_v14, %s3024_s28 }
  0x3c   : > { %2722 = vmatmul.mubr.bf16.vlgmr.msra.gmra.mrb[0].mxu0 %v2926_v17  ;;  %1445 = vrot.lane.b32.xlu0 %v3188_v13, %s3025_s21 }
  0x3d   : > { %2725 = vmatprep.mubr.bf16.mxu0 %v2927_v18  ;;  %1447 = vrot.lane.b32.xlu1 %v3192_v14, %s3025_s21 }
  0x40   : > { %1417 = vrot.lane.b32.xlu0 %v3196_v15, %s3023_s24 }
  0x41   : > { %1419 = vrot.lane.b32.xlu1 %v3200_v16, %s3023_s24 }
  0x44   : > { %2726 = vmatmul.mubr.bf16.gmra.mrb[4].mxu0 %v2928_v19  ;;  %1433 = vrot.lane.b32.xlu0 %v3196_v15, %s3024_s28 }
  0x45   : > { %2729 = vmatprep.mubr.bf16.mxu0 %v2929_v20  ;;  %1435 = vrot.lane.b32.xlu1 %v3200_v16, %s3024_s28 }
  0x48   : > { %1449 = vrot.lane.b32.xlu0 %v3196_v15, %s3025_s21 }
  0x49   : > { %1451 = vrot.lane.b32.xlu1 %v3200_v16, %s3025_s21 }
  0x4c   : > { %2730 = vmatmul.mubr.bf16.gmra.mrb[8].mxu0 %v2930_v21 }
  0x4d   : > { %2733 = vmatprep.mubr.bf16.mxu0 %v2931_v22 }
  0x54   : > { %2734 = vmatmul.mubr.bf16.gmra.mrb[12].mxu0 %v2932_v23 }
  0x55   : > { %2737 = vmatprep.mubr.bf16.mxu0 %v2933_v24 }
  0x5c   : > { %2738 = vmatmul.mubr.bf16.gmra.mrb[16].mxu0 %v2934_v25 }
  0x5d   : > { %2741 = vmatprep.mubr.bf16.mxu0 %v2935_v26 }
  0x64   : > { %2742 = vmatmul.mubr.bf16.gmra.mrb[20].mxu0 %v2936_v27 }
  0x65   : > { %2745 = vmatprep.mubr.bf16.mxu0 %v2937_v28 }
  0x6c   : > { %2746 = vmatmul.mubr.bf16.gmra.mrb[24].mxu0 %v2938_v29 }
  0x6d   : > { %2749 = vmatprep.mubr.bf16.mxu0 %v2939_v30 }
  0x74   : > { %2750 = vmatmul.mubr.bf16.gmra.mrb[28].mxu0 %v2940_v31 }
  0x75   : > { %2753 = vmatprep.mubr.bf16.mxu0 %v2941_v32 }
  0x7c   : > { %2754 = vmatmul.mubr.bf16.gmra.mrb[32].mxu0 %v2942_v33 }
  0x7d   : > { %2757 = vmatprep.mubr.bf16.mxu0 %v2943_v34 }
  0x84   : > { %2758 = vmatmul.mubr.bf16.gmra.mrb[36].mxu0 %v2944_v35 }
  0x85   : > { %2761 = vmatprep.mubr.bf16.mxu0 %v2945_v36 }
  0x8c   : > { %2762 = vmatmul.mubr.bf16.gmra.mrb[40].mxu0 %v2946_v37 }
  0x8d   : > { %2765 = vmatprep.mubr.bf16.mxu0 %v2947_v38 }
  0x8e   : > { %v1406_v48 = vpop.permute.xlu0 %1405 }
  0x8f   : > { %v1455_v49 = vsel %vm1346_vm1, %v3170_v8, %v1406_v48  ;;  %v1422_v50 = vpop.permute.xlu1 %1421 }
  0x90   : > { %v1478_v51 = vsel %vm1363_vm2, %v1455_v49, %v1422_v50 }
  0x92   : > { %v1408_v52 = vpop.permute.xlu0 %1407 }
  0x93   : > { %v1458_v53 = vsel %vm1346_vm1, %v3172_v9, %v1408_v52  ;;  %v1424_v54 = vpop.permute.xlu1 %1423 }
  0x94   : > { %2766 = vmatmul.mubr.bf16.gmra.mrb[44].mxu0 %v2948_v39  ;;  %v1480_v55 = vsel %vm1363_vm2, %v1458_v53, %v1424_v54 }
  0x95   : > { %2769 = vmatprep.mubr.bf16.mxu0 %v2949_v40 }
  0x96   : > { %v1438_v56 = vpop.permute.xlu0 %1437 }
  0x97   : > { %v3353_v57 = vsel %vm1380_vm3, %v1478_v51, %v1438_v56  ;;  %v1440_v58 = vpop.permute.xlu1 %1439 }
  0x98   : > { %v3356_v59 = vsel %vm1380_vm3, %v1480_v55, %v1440_v58 }
  0x9a   : > { %v1410_v60 = vpop.permute.xlu0 %1409 }
  0x9b   : > { %v1412_v61 = vpop.permute.xlu1 %1411  ;;  %v1461_v63 = vsel %vm1346_vm1, %v3180_v11, %v1410_v60 }
  0x9c   : > { %2770 = vmatmul.mubr.bf16.gmra.mrb[48].mxu0 %v2950_v41  ;;  %v1464_v62 = vsel %vm1346_vm1, %v3184_v12, %v1412_v61 }
  0x9d   : > { %2773 = vmatprep.mubr.bf16.mxu0 %v2951_v42 }
  0x9e   : > { %v1426_v1 = vpop.permute.xlu0 %1425 }
  0x9f   : > { %v1428_v0 = vpop.permute.xlu1 %1427  ;;  %v1482_v3 = vsel %vm1363_vm2, %v1461_v63, %v1426_v1 }
  0xa0   : > { %v1484_v2 = vsel %vm1363_vm2, %v1464_v62, %v1428_v0  ;;  %v2957_v62 = vld [vmem:[%s3121_s17] sm:$0xff]  }
  0xa1   : > { %2785 = vmatprep.subr.bf16.mxu1 %v2957_v62 }
  0xa2   : > { %v1442_v5 = vpop.permute.xlu0 %1441  ;;  %2786 = vmatpush3.bf16.msra.mxu1 %v2957_v62  ;;  %v3477_v62 = vld [vmem:[%s3130_s23] sm:$0xff]  }
  0xa3   : > { %v1444_v4 = vpop.permute.xlu1 %1443  ;;  %v3368_v7 = vsel %vm1380_vm3, %v1482_v3, %v1442_v5 }
  0xa4   : > { %2774 = vmatmul.mubr.bf16.gmra.mrb[52].mxu0 %v2952_v43  ;;  %v3365_v6 = vsel %vm1380_vm3, %v1484_v2, %v1444_v4  ;;  %v2958_v2 = vld [vmem:[%s3121_s17 + $0x8] sm:$0xff]   ;;  %v2959_v4 = vld [vmem:[%s3121_s17 + $0x10] sm:$0xff]  }
  0xa5   : > { %2777 = vmatprep.mubr.bf16.mxu0 %v2953_v44  ;;  %2787 = vmatprep.subr.bf16.mxu1 %v2958_v2 }
  0xa6   : > { %v1414_v9 = vpop.permute.xlu0 %1413  ;;  %2788 = vmatpush3.bf16.msra.mxu1 %v2958_v2 }
  0xa7   : > { %v1416_v8 = vpop.permute.xlu1 %1415  ;;  %v1467_v11 = vsel %vm1346_vm1, %v3188_v13, %v1414_v9  ;;  %2789 = vmatprep.subr.bf16.mxu1 %v2959_v4 }
  0xa8   : > { %v1470_v10 = vsel %vm1346_vm1, %v3192_v14, %v1416_v8 }
  0xaa   : > { %v1430_v17 = vpop.permute.xlu0 %1429  ;;  %2790 = vmatpush3.bf16.msra.mxu1 %v2959_v4 }
  0xab   : > { %v1432_v12 = vpop.permute.xlu1 %1431  ;;  %v1486_v19 = vsel %vm1363_vm2, %v1467_v11, %v1430_v17 }
  0xac   : > { %2778 = vmatmul.mubr.bf16.gmra.mrb[56].mxu0 %v2954_v45  ;;  %v1488_v18 = vsel %vm1363_vm2, %v1470_v10, %v1432_v12  ;;  %v2960_v10 = vld [vmem:[%s3121_s17 + $0x18] sm:$0xff]   ;;  %v2961_v12 = vld [vmem:[%s3121_s17 + $0x20] sm:$0xff]  }
  0xad   : > { %2781 = vmatprep.mubr.bf16.mxu0 %v2955_v46  ;;  %2791 = vmatprep.subr.bf16.mxu1 %v2960_v10 }
  0xae   : > { %v1446_v25 = vpop.permute.xlu0 %1445  ;;  %2792 = vmatpush3.bf16.msra.mxu1 %v2960_v10 }
  0xaf   : > { %v1448_v23 = vpop.permute.xlu1 %1447  ;;  %v3388_v13 = vsel %vm1380_vm3, %v1486_v19, %v1446_v25  ;;  %2793 = vmatprep.subr.bf16.mxu1 %v2961_v12 }
  0xb0   : > { %v3385_v14 = vsel %vm1380_vm3, %v1488_v18, %v1448_v23  ;;  %v2962_v23 = vld [vmem:[%s3121_s17 + $0x28] sm:$0xff]  }
  0xb2   : > { %v1418_v27 = vpop.permute.xlu0 %1417  ;;  %2794 = vmatpush3.bf16.msra.mxu1 %v2961_v12 }
  0xb3   : > { %v1420_v26 = vpop.permute.xlu1 %1419  ;;  %v1473_v31 = vsel %vm1346_vm1, %v3196_v15, %v1418_v27  ;;  %2795 = vmatprep.subr.bf16.mxu1 %v2962_v23 }
  0xb4   : > { %2782 = vmatmul.mubr.bf16.gmra.mrb[60].mxu0 %v2956_v47  ;;  %v1476_v29 = vsel %vm1346_vm1, %v3200_v16, %v1420_v26  ;;  %v2963_v26 = vld [vmem:[%s3121_s17 + $0x30] sm:$0xff]  }
  0xb6   : > { %v1434_v36 = vpop.permute.xlu0 %1433  ;;  %2796 = vmatpush3.bf16.msra.mxu1 %v2962_v23 }
  0xb7   : > { %v1436_v33 = vpop.permute.xlu1 %1435  ;;  %v3406_v37 = vsel %vm1363_vm2, %v1473_v31, %v1434_v36  ;;  %2797 = vmatprep.subr.bf16.mxu1 %v2963_v26 }
  0xb8   : > { %v3403_v35 = vsel %vm1363_vm2, %v1476_v29, %v1436_v33  ;;  %v2964_v33 = vld [vmem:[%s3121_s17 + $0x38] sm:$0xff]  }
  0xba   : > { %2798 = vmatpush3.bf16.msra.mxu1 %v2963_v26 }
  0xbb   : > { %2799 = vmatprep.subr.bf16.mxu1 %v2964_v33 }
  0xbe   : > { %2800 = vmatpush3.bf16.msra.mxu1 %v2964_v33 }
  0xbf   : > { %2817 = vmatprep.subr.bf16.mxu1 %v3477_v62 }
 0x10f   : > { %v3376_v20 = vpop.f32.mrb[0].mxu0 }
 0x110   : > { %v3378_v21 = vpop.f32.mrb[1].mxu0 }
 0x111   : > { %v3380_v22 = vpop.f32.mrb[2].mxu0 }
 0x112   : > { %v3382_v24 = vpop.f32.mrb[3].mxu0 }
 0x117   : > { %v3390_v28 = vpop.f32.mrb[4].mxu0 }
 0x118   : > { %v3394_v30 = vpop.f32.mrb[5].mxu0 }
 0x119   : > { %v3398_v32 = vpop.f32.mrb[6].mxu0 }
 0x11a   : > { %v3400_v34 = vpop.f32.mrb[7].mxu0 }
 0x11f   : > { %v3408_v38 = vpop.f32.mrb[8].mxu0 }
 0x120   : > { %v3410_v16 = vpop.f32.mrb[9].mxu0 }
 0x121   : > { %v3412_v39 = vpop.f32.mrb[10].mxu0 }
 0x122   : > { %v3414_v40 = vpop.f32.mrb[11].mxu0 }
 0x127   : > { %v3416_v15 = vpop.f32.mrb[12].mxu0 }
 0x128   : > { %v3418_v41 = vpop.f32.mrb[13].mxu0 }
 0x129   : > { %v3420_v42 = vpop.f32.mrb[14].mxu0 }
 0x12a   : > { %v3422_v43 = vpop.f32.mrb[15].mxu0 }
 0x12b   : > { %3837 = vst [vmem:[#allocation7_spill] sm:$0xff] %v3422_v43 }
 0x12f   : > { %v2739_v44 = vpop.f32.mrb[16].mxu0 }
 0x130   : > { %1174 = vrot.lane.b32.xlu0 %v2739_v44, %s3023_s24  ;;  %v963_v45 = vpop.f32.mrb[17].mxu0 }
 0x131   : > { %v2740_v46 = vpop.f32.mrb[18].mxu0 }
 0x132   : > { %1176 = vrot.lane.b32.xlu1 %v2740_v46, %s3023_s24  ;;  %v966_v47 = vpop.f32.mrb[19].mxu0 }
 0x134   : > { %1170 = vrot.lane.b32.xlu0 %v963_v45, %s3023_s24 }
 0x136   : > { %1172 = vrot.lane.b32.xlu1 %v966_v47, %s3023_s24 }
 0x137   : > { %v2743_v48 = vpop.f32.mrb[20].mxu0 }
 0x138   : > { %1182 = vrot.lane.b32.xlu0 %v2743_v48, %s3023_s24  ;;  %v979_v49 = vpop.f32.mrb[21].mxu0 }
 0x139   : > { %v2744_v50 = vpop.f32.mrb[22].mxu0 }
 0x13a   : > { %1184 = vrot.lane.b32.xlu1 %v2744_v50, %s3023_s24  ;;  %v982_v51 = vpop.f32.mrb[23].mxu0 }
 0x13c   : > { %1178 = vrot.lane.b32.xlu0 %v979_v49, %s3023_s24 }
 0x13e   : > { %1180 = vrot.lane.b32.xlu1 %v982_v51, %s3023_s24 }
 0x13f   : > { %v2747_v52 = vpop.f32.mrb[24].mxu0 }
 0x140   : > { %1190 = vrot.lane.b32.xlu0 %v2747_v52, %s3023_s24  ;;  %v995_v53 = vpop.f32.mrb[25].mxu0 }
 0x141   : > { %v2748_v54 = vpop.f32.mrb[26].mxu0 }
 0x142   : > { %1192 = vrot.lane.b32.xlu1 %v2748_v54, %s3023_s24  ;;  %v998_v55 = vpop.f32.mrb[27].mxu0 }
 0x144   : > { %1186 = vrot.lane.b32.xlu0 %v995_v53, %s3023_s24 }
 0x146   : > { %1188 = vrot.lane.b32.xlu1 %v998_v55, %s3023_s24 }
 0x147   : > { %v2751_v56 = vpop.f32.mrb[28].mxu0 }
 0x148   : > { %1198 = vrot.lane.b32.xlu0 %v2751_v56, %s3023_s24  ;;  %v1011_v58 = vpop.f32.mrb[29].mxu0 }
 0x149   : > { %v2752_v60 = vpop.f32.mrb[30].mxu0 }
 0x14a   : > { %1200 = vrot.lane.b32.xlu1 %v2752_v60, %s3023_s24  ;;  %v1014_v61 = vpop.f32.mrb[31].mxu0 }
 0x14c   : > { %1194 = vrot.lane.b32.xlu0 %v1011_v58, %s3023_s24 }
 0x14e   : > { %1196 = vrot.lane.b32.xlu1 %v1014_v61, %s3023_s24 }
 0x14f   : > { %v2755_v63 = vpop.f32.mrb[32].mxu0 }
 0x150   : > { %1238 = vrot.lane.b32.xlu0 %v2755_v63, %s3024_s28  ;;  %v1027_v0 = vpop.f32.mrb[33].mxu0  ;;  %v3484_v63 = vpop.permute.xlu0 %1449 }
 0x151   : > { %v2756_v1 = vpop.f32.mrb[34].mxu0 }
 0x152   : > { %1240 = vrot.lane.b32.xlu1 %v2756_v1, %s3024_s28  ;;  %v1030_v3 = vpop.f32.mrb[35].mxu0 }
 0x154   : > { %1234 = vrot.lane.b32.xlu0 %v1027_v0, %s3024_s28  ;;  %v3486_v0 = vpop.permute.xlu1 %1451 }
 0x156   : > { %1236 = vrot.lane.b32.xlu1 %v1030_v3, %s3024_s28 }
 0x157   : > { %v2759_v5 = vpop.f32.mrb[36].mxu0 }
 0x158   : > { %1246 = vrot.lane.b32.xlu0 %v2759_v5, %s3024_s28  ;;  %v1043_v8 = vpop.f32.mrb[37].mxu0 }
 0x159   : > { %v2760_v9 = vpop.f32.mrb[38].mxu0 }
 0x15a   : > { %1248 = vrot.lane.b32.xlu1 %v2760_v9, %s3024_s28  ;;  %v1046_v11 = vpop.f32.mrb[39].mxu0 }
 0x15c   : > { %1242 = vrot.lane.b32.xlu0 %v1043_v8, %s3024_s28 }
 0x15e   : > { %1244 = vrot.lane.b32.xlu1 %v1046_v11, %s3024_s28 }
 0x15f   : > { %v2763_v17 = vpop.f32.mrb[40].mxu0 }
 0x160   : > { %1254 = vrot.lane.b32.xlu0 %v2763_v17, %s3024_s28  ;;  %v1059_v18 = vpop.f32.mrb[41].mxu0 }
 0x161   : > { %v2764_v19 = vpop.f32.mrb[42].mxu0 }
 0x162   : > { %1256 = vrot.lane.b32.xlu1 %v2764_v19, %s3024_s28  ;;  %v1062_v25 = vpop.f32.mrb[43].mxu0 }
 0x164   : > { %1250 = vrot.lane.b32.xlu0 %v1059_v18, %s3024_s28 }
 0x166   : > { %1252 = vrot.lane.b32.xlu1 %v1062_v25, %s3024_s28 }
 0x167   : > { %v2767_v27 = vpop.f32.mrb[44].mxu0 }
 0x168   : > { %v1075_v29 = vpop.f32.mrb[45].mxu0 }
 0x169   : > { %1258 = vrot.lane.b32.xlu0 %v1075_v29, %s3024_s28  ;;  %v2768_v31 = vpop.f32.mrb[46].mxu0 }
 0x16a   : > { %v1078_v36 = vpop.f32.mrb[47].mxu0 }
 0x16b   : > { %1260 = vrot.lane.b32.xlu1 %v1078_v36, %s3024_s28 }
 0x16f   : > { %v2771_v44 = vpop.f32.mrb[48].mxu0 }
 0x170   : > { %1302 = vrot.lane.b32.xlu0 %v2771_v44, %s3025_s21  ;;  %v1091_v45 = vpop.f32.mrb[49].mxu0 }
 0x171   : > { %v2772_v46 = vpop.f32.mrb[50].mxu0 }
 0x172   : > { %1304 = vrot.lane.b32.xlu1 %v2772_v46, %s3025_s21  ;;  %v1094_v47 = vpop.f32.mrb[51].mxu0 }
 0x174   : > { %1298 = vrot.lane.b32.xlu0 %v1091_v45, %s3025_s21 }
 0x176   : > { %1300 = vrot.lane.b32.xlu1 %v1094_v47, %s3025_s21 }
 0x177   : > { %v2775_v48 = vpop.f32.mrb[52].mxu0 }
 0x178   : > { %1310 = vrot.lane.b32.xlu0 %v2775_v48, %s3025_s21  ;;  %v1107_v49 = vpop.f32.mrb[53].mxu0 }
 0x179   : > { %v2776_v50 = vpop.f32.mrb[54].mxu0 }
 0x17a   : > { %1312 = vrot.lane.b32.xlu1 %v2776_v50, %s3025_s21  ;;  %v1110_v51 = vpop.f32.mrb[55].mxu0 }
 0x17c   : > { %1306 = vrot.lane.b32.xlu0 %v1107_v49, %s3025_s21 }
 0x17e   : > { %1308 = vrot.lane.b32.xlu1 %v1110_v51, %s3025_s21  ;;  %v1520_v51 = vunpack.c.l.bf16 %v3356_v59 }
 0x17f   : > { %v2779_v52 = vpop.f32.mrb[56].mxu0 }
 0x180   : > { %1318 = vrot.lane.b32.xlu0 %v2779_v52, %s3025_s21  ;;  %v1123_v53 = vpop.f32.mrb[57].mxu0 }
 0x181   : > { %v2780_v54 = vpop.f32.mrb[58].mxu0 }
 0x182   : > { %1320 = vrot.lane.b32.xlu1 %v2780_v54, %s3025_s21  ;;  %v1126_v55 = vpop.f32.mrb[59].mxu0 }
 0x184   : > { %1314 = vrot.lane.b32.xlu0 %v1123_v53, %s3025_s21  ;;  %v1521_v53 = vunpack.c.h.bf16 %v3356_v59  ;;  %v1519_v59 = vunpack.c.h.bf16 %v3353_v57 }
 0x186   : > { %1316 = vrot.lane.b32.xlu1 %v1126_v55, %s3025_s21 }
 0x187   : > { %v2783_v56 = vpop.f32.mrb[60].mxu0 }
 0x188   : > { %1262 = vrot.lane.b32.xlu0 %v2767_v27, %s3024_s28  ;;  %v1139_v58 = vpop.f32.mrb[61].mxu0 }
 0x189   : > { %v2784_v60 = vpop.f32.mrb[62].mxu0 }
 0x18a   : > { %1264 = vrot.lane.b32.xlu1 %v2768_v31, %s3024_s28  ;;  %v1142_v61 = vpop.f32.mrb[63].mxu0  ;;  %s3842_s28 = scalar_lea.vmem %s3819_s2, %s3111_s27 }
 0x18c   : > { %1322 = vrot.lane.b32.xlu0 %v1139_v58, %s3025_s21  ;;  %v1518_v58 = vunpack.c.l.bf16 %v3353_v57 }
 0x18e   : > { %1324 = vrot.lane.b32.xlu1 %v1142_v61, %s3025_s21 }
 0x190   : > { %1326 = vrot.lane.b32.xlu0 %v2783_v56, %s3025_s21  ;;  %v3537_v56 = vld [vmem:[%s3842_s28] ss:$0 sm:$0xff] }
 0x191   : > { %v1542_v61 = vmul.f32 %v3537_v56, %v1520_v51  ;;  %v1524_v51 = vunpack.c.l.bf16 %v3365_v6 }
 0x192   : > { %1328 = vrot.lane.b32.xlu1 %v2784_v60, %s3025_s21 }
 0x1a2   : > { %v1175_v1 = vpop.permute.xlu0 %1174 }
 0x1a3   : > { %v1349_v55 = vsel %vm1346_vm1, %v3376_v20, %v1175_v1 }
 0x1a4   : > { %v1177_v2 = vpop.permute.xlu1 %1176 }
 0x1a6   : > { %v1171_v3 = vpop.permute.xlu0 %1170 }
 0x1a7   : > { %v1347_v43 = vsel %vm1346_vm1, %v3378_v21, %v1171_v3 }
 0x1a8   : > { %v1173_v4 = vpop.permute.xlu1 %1172 }
 0x1aa   : > { %v1183_v5 = vpop.permute.xlu0 %1182 }
 0x1ac   : > { %v3488_v8 = vpop.permute.xlu1 %1184 }
 0x1ae   : > { %v3490_v9 = vpop.permute.xlu0 %1178 }
 0x1b0   : > { %v3492_v10 = vpop.permute.xlu1 %1180 }
 0x1b2   : > { %v3494_v11 = vpop.permute.xlu0 %1190 }
 0x1b4   : > { %v3496_v12 = vpop.permute.xlu1 %1192 }
 0x1b6   : > { %v3498_v17 = vpop.permute.xlu0 %1186 }
 0x1b8   : > { %v3500_v18 = vpop.permute.xlu1 %1188 }
 0x1ba   : > { %v1199_v19 = vpop.permute.xlu0 %1198 }
 0x1bb   : > { %v3504_v23 = vsel %vm1346_vm1, %v3416_v15, %v1199_v19 }
 0x1bc   : > { %3838 = vst [vmem:[#allocation8_spill] sm:$0xff] %v3504_v23  ;;  %v1201_v25 = vpop.permute.xlu1 %1200  ;;  %v1543_v23 = vmul.f32 %v3537_v56, %v1521_v53  ;;  %v1541_v53 = vmul.f32 %v3537_v56, %v1519_v59 }
 0x1bd   : > { %v3508_v26 = vsel %vm1346_vm1, %v3420_v42, %v1201_v25  ;;  %v1350_v25 = vsel %vm1346_vm1, %v3380_v22, %v1177_v2  ;;  %v1540_v22 = vmul.f32 %v3537_v56, %v1518_v58  ;;  %v1348_v2 = vsel %vm1346_vm1, %v3382_v24, %v1173_v4 }
 0x1be   : > { %3839 = vst [vmem:[#allocation9_spill] sm:$0xff] %v3508_v26  ;;  %v3510_v27 = vpop.permute.xlu0 %1194  ;;  %v1546_v4 = vmul.f32 %v3537_v56, %v1524_v51  ;;  %v1352_v51 = vsel %vm1346_vm1, %v3400_v34, %v3492_v10  ;;  %v2967_v10 = vld [vmem:[%s3130_s23 + $0x10] sm:$0xff]  }
 0x1c0   : > { %v3512_v29 = vpop.permute.xlu1 %1196 }
 0x1c1   : > { %3840 = vst [vmem:[#allocation10_spill] sm:$0xff] %v3512_v29 }
 0x1c2   : > { %v1239_v31 = vpop.permute.xlu0 %1238 }
 0x1c3   : > { %v1366_v60 = vsel %vm1363_vm2, %v1349_v55, %v1239_v31 }
 0x1c4   : > { %v1241_v33 = vpop.permute.xlu1 %1240 }
 0x1c5   : > { %v1367_v1 = vsel %vm1363_vm2, %v1350_v25, %v1241_v33 }
 0x1c6   : > { %v1235_v36 = vpop.permute.xlu0 %1234 }
 0x1c7   : > { %v1364_v57 = vsel %vm1363_vm2, %v1347_v43, %v1235_v36  ;;  %v1353_v43 = vsel %vm1346_vm1, %v3390_v28, %v1183_v5  ;;  %v1522_v36 = vunpack.c.l.bf16 %v3368_v7 }
 0x1c8   : > { %v1237_v44 = vpop.permute.xlu1 %1236 }
 0x1c9   : > { %v1365_v21 = vsel %vm1363_vm2, %v1348_v2, %v1237_v44 }
 0x1ca   : > { %v1247_v45 = vpop.permute.xlu0 %1246 }
 0x1cb   : > { %v1370_v24 = vsel %vm1363_vm2, %v1353_v43, %v1247_v45  ;;  %v1351_v45 = vsel %vm1346_vm1, %v3394_v30, %v3490_v9  ;;  %v1529_v9 = vunpack.c.h.bf16 %v3385_v14 }
 0x1cc   : > { %v1249_v46 = vpop.permute.xlu1 %1248 }
 0x1ce   : > { %v1243_v47 = vpop.permute.xlu0 %1242 }
 0x1d0   : > { %v3514_v48 = vpop.permute.xlu1 %1244 }
 0x1d2   : > { %v3516_v15 = vpop.permute.xlu0 %1254 }
 0x1d4   : > { %v3518_v49 = vpop.permute.xlu1 %1256 }
 0x1d6   : > { %v3520_v42 = vpop.permute.xlu0 %1250 }
 0x1d8   : > { %v3522_v50 = vpop.permute.xlu1 %1252 }
 0x1db   : > { %v3525_v52 = vpop.permute.xlu0 %1258 }
 0x1dd   : > { %v3528_v54 = vpop.permute.xlu1 %1260 }
 0x1de   : > { %3841 = vst [vmem:[#allocation11_spill] sm:$0xff] %v3528_v54 }
 0x1e2   : > { %v1303_v19 = vpop.permute.xlu0 %1302 }
 0x1e3   : > { %v1383_v20 = vsel %vm1380_vm3, %v1366_v60, %v1303_v19  ;;  %v1525_v60 = vunpack.c.h.bf16 %v3365_v6  ;;  %v1523_v6 = vunpack.c.h.bf16 %v3368_v7  ;;  %v2966_v7 = vld [vmem:[%s3130_s23 + $0x8] sm:$0xff]  }
 0x1e4   : > { %v1558_v26 = vadd.f32 %v1542_v61, %v1383_v20  ;;  %v1305_v54 = vpop.permute.xlu1 %1304 }
 0x1e5   : > { %v1384_v31 = vsel %vm1380_vm3, %v1367_v1, %v1305_v54  ;;  %v1547_v19 = vmul.f32 %v3537_v56, %v1525_v60  ;;  %v1528_v1 = vunpack.c.l.bf16 %v3385_v14  ;;  %v1545_v30 = vmul.f32 %v3537_v56, %v1523_v6 }
 0x1e6   : > { %v1559_v55 = vadd.f32 %v1543_v23, %v1384_v31  ;;  %v1299_v29 = vpop.permute.xlu0 %1298 }
 0x1e7   : > { %v1381_v33 = vsel %vm1380_vm3, %v1364_v57, %v1299_v29  ;;  %v1550_v60 = vmul.f32 %v3537_v56, %v1528_v1 }
 0x1e8   : > { %v1301_v3 = vpop.permute.xlu1 %1300  ;;  %v1556_v54 = vadd.f32 %v1540_v22, %v1381_v33  ;;  %v1573_v61 = vpack.c.bf16 %v1559_v55, %v1558_v26  ;;  %v1354_v26 = vsel %vm1346_vm1, %v3398_v32, %v3488_v8  ;;  %v1368_v32 = vsel %vm1363_vm2, %v1351_v45, %v1243_v47 }
 0x1e9   : > { %v1382_v23 = vsel %vm1380_vm3, %v1365_v21, %v1301_v3  ;;  %v1371_v28 = vsel %vm1363_vm2, %v1354_v26, %v1249_v46  ;;  %v1544_v46 = vmul.f32 %v3537_v56, %v1522_v36  ;;  %v1369_v47 = vsel %vm1363_vm2, %v1352_v51, %v3514_v48  ;;  %v2968_v36 = vld [vmem:[%s3130_s23 + $0x18] sm:$0xff]  }
 0x1ea   : > { %v1311_v29 = vpop.permute.xlu0 %1310  ;;  %v1557_v58 = vadd.f32 %v1541_v53, %v1382_v23  ;;  %v1357_v33 = vsel %vm1346_vm1, %v3408_v38, %v3494_v11  ;;  %v1526_v53 = vunpack.c.l.bf16 %v3388_v13  ;;  %v1358_v38 = vsel %vm1346_vm1, %v3412_v39, %v3496_v12 }
 0x1eb   : > { %v1387_v44 = vsel %vm1380_vm3, %v1370_v24, %v1311_v29  ;;  %v1374_v14 = vsel %vm1363_vm2, %v1357_v33, %v3516_v15  ;;  %v1375_v3 = vsel %vm1363_vm2, %v1358_v38, %v3518_v49  ;;  %v1355_v23 = vsel %vm1346_vm1, %v3410_v16, %v3498_v17  ;;  %v3847_v33 = vld [vmem:[#allocation9_spill] sm:$0xff] }
 0x1ec   : > { %v1562_v5 = vadd.f32 %v1546_v4, %v1387_v44  ;;  %v1313_v59 = vpop.permute.xlu1 %1312  ;;  %v1572_v25 = vpack.c.bf16 %v1557_v58, %v1556_v54  ;;  %v1372_v39 = vsel %vm1363_vm2, %v1355_v23, %v3520_v42  ;;  %v1548_v49 = vmul.f32 %v3537_v56, %v1526_v53  ;;  %v2971_v38 = vld [vmem:[%s3130_s23 + $0x30] sm:$0xff]  }
 0x1ed   : > { %v1388_v20 = vsel %vm1380_vm3, %v1371_v28, %v1313_v59  ;;  %v1512_v4 = vsel %vm1380_vm3, %v3406_v37, %v3484_v63  ;;  %v1356_v16 = vsel %vm1346_vm1, %v3414_v40, %v3500_v18  ;;  %v2969_v37 = vld [vmem:[%s3130_s23 + $0x20] sm:$0xff]   ;;  %v1515_v18 = vsel %vm1380_vm3, %v3403_v35, %v3486_v0 }
 0x1ee   : > { %v1563_v8 = vadd.f32 %v1547_v19, %v1388_v20  ;;  %2801 = vmatprep.mubr.bf16.mxu1 %v1572_v25  ;;  %v1307_v31 = vpop.permute.xlu0 %1306  ;;  %v1373_v42 = vsel %vm1363_vm2, %v1356_v16, %v3522_v50  ;;  %v1530_v63 = vunpack.c.l.bf16 %v1512_v4  ;;  %v1359_v59 = vsel %vm1346_vm1, %v3418_v41, %v3510_v27  ;;  %v2970_v25 = vld [vmem:[%s3130_s23 + $0x28] sm:$0xff]  }
 0x1ef   : > { %v1385_v57 = vsel %vm1380_vm3, %v1368_v32, %v1307_v31  ;;  %2802 = vmatmul.mubr.bf16.vlgmr.msra.gmra.mrb[0].mxu1 %v1573_v61  ;;  %v1551_v61 = vmul.f32 %v3537_v56, %v1529_v9  ;;  %v1532_v45 = vunpack.c.l.bf16 %v1515_v18  ;;  %v1376_v20 = vsel %vm1363_vm2, %v1359_v59, %v3525_v52  ;;  %v3843_v32 = vld [vmem:[#allocation10_spill] sm:$0xff]  ;;  %v3844_v35 = vld [vmem:[#allocation7_spill] sm:$0xff] }
 0x1f0   : > { %v1560_v55 = vadd.f32 %v1544_v46, %v1385_v57  ;;  %v1309_v22 = vpop.permute.xlu1 %1308  ;;  %v1575_v2 = vpack.c.bf16 %v1563_v8, %v1562_v5  ;;  %2818 = vmatpush3.bf16.msra.mxu1 %v3477_v62  ;;  %v1527_v62 = vunpack.c.h.bf16 %v3388_v13  ;;  %v1531_v5 = vunpack.c.h.bf16 %v1512_v4  ;;  %v3845_v31 = vld [vmem:[#allocation11_spill] sm:$0xff] }
 0x1f1   : > { %v1386_v34 = vsel %vm1380_vm3, %v1369_v47, %v1309_v22  ;;  %2819 = vmatprep.subr.bf16.mxu1 %v2966_v7  ;;  %v1360_v0 = vsel %vm1346_vm1, %v3844_v35, %v3843_v32  ;;  %v1533_v46 = vunpack.c.h.bf16 %v1515_v18 }
 0x1f2   : > { %v1561_v48 = vadd.f32 %v1545_v30, %v1386_v34  ;;  %v1319_v21 = vpop.permute.xlu0 %1318  ;;  %v1549_v58 = vmul.f32 %v3537_v56, %v1527_v62  ;;  %v1377_v41 = vsel %vm1363_vm2, %v1360_v0, %v3845_v31  ;;  %v1553_v51 = vmul.f32 %v3537_v56, %v1531_v5  ;;  %v3846_v30 = vld [vmem:[#allocation8_spill] sm:$0xff] }
 0x1f3   : > { %v1391_v11 = vsel %vm1380_vm3, %v1374_v14, %v1319_v21  ;;  %v1555_v53 = vmul.f32 %v3537_v56, %v1533_v46  ;;  %v2975_v5 = vld [vmem:[%s3139_s13 + $0x10] sm:$0xff]  }
 0x1f4   : > { %v1566_v54 = vadd.f32 %v1550_v60, %v1391_v11  ;;  %v1321_v15 = vpop.permute.xlu1 %1320  ;;  %v1574_v43 = vpack.c.bf16 %v1561_v48, %v1560_v55  ;;  %2820 = vmatpush3.bf16.msra.mxu1 %v2966_v7  ;;  %v1552_v7 = vmul.f32 %v3537_v56, %v1530_v63  ;;  %v1554_v55 = vmul.f32 %v3537_v56, %v1532_v45  ;;  %v2972_v11 = vld [vmem:[%s3130_s23 + $0x38] sm:$0xff]   ;;  %v3661_v56 = vld [vmem:[%s506_s20] ss:$0 sm:$0xff] }
 0x1f5   : > { %v1392_v13 = vsel %vm1380_vm3, %v1375_v3, %v1321_v15  ;;  %2821 = vmatprep.subr.bf16.mxu1 %v2967_v10  ;;  %v2973_v3 = vld [vmem:[%s3139_s13] sm:$0xff]  }
 0x1f6   : > { %v1567_v12 = vadd.f32 %v1551_v61, %v1392_v13  ;;  %2805 = vmatprep.mubr.bf16.mxu1 %v1574_v43  ;;  %v1315_v24 = vpop.permute.xlu0 %1314 }
 0x1f7   : > { %v1389_v17 = vsel %vm1380_vm3, %v1372_v39, %v1315_v24  ;;  %2806 = vmatmul.mubr.bf16.gmra.mrb[4].mxu1 %v1575_v2 }
 0x1f8   : > { %v1564_v29 = vadd.f32 %v1548_v49, %v1389_v17  ;;  %v1317_v6 = vpop.permute.xlu1 %1316  ;;  %v1577_v26 = vpack.c.bf16 %v1567_v12, %v1566_v54  ;;  %2822 = vmatpush3.bf16.msra.mxu1 %v2967_v10 }
 0x1f9   : > { %v1390_v44 = vsel %vm1380_vm3, %v1373_v42, %v1317_v6  ;;  %2823 = vmatprep.subr.bf16.mxu1 %v2968_v36  ;;  %v2974_v6 = vld [vmem:[%s3139_s13 + $0x8] sm:$0xff]  }
 0x1fa   : > { %v1565_v28 = vadd.f32 %v1549_v58, %v1390_v44  ;;  %v1263_v40 = vpop.permute.xlu0 %1262 }
 0x1fb   : > { %v1378_v9 = vsel %vm1363_vm2, %v3846_v30, %v1263_v40 }
 0x1fc   : > { %v1265_v50 = vpop.permute.xlu1 %1264  ;;  %v1576_v19 = vpack.c.bf16 %v1565_v28, %v1564_v29  ;;  %2824 = vmatpush3.bf16.msra.mxu1 %v2968_v36 }
 0x1fd   : > { %2825 = vmatprep.subr.bf16.mxu1 %v2969_v37  ;;  %v1379_v34 = vsel %vm1363_vm2, %v3847_v33, %v1265_v50 }
 0x1fe   : > { %2809 = vmatprep.mubr.bf16.mxu1 %v1576_v19  ;;  %v1323_v1 = vpop.permute.xlu0 %1322 }
 0x1ff   : > { %v1393_v8 = vsel %vm1380_vm3, %v1376_v20, %v1323_v1  ;;  %2810 = vmatmul.mubr.bf16.gmra.mrb[8].mxu1 %v1577_v26  ;;  %v2976_v1 = vld [vmem:[%s3139_s13 + $0x18] sm:$0xff]  }
 0x200   : > { %v1568_v27 = vadd.f32 %v1552_v7, %v1393_v8  ;;  %v1325_v57 = vpop.permute.xlu1 %1324  ;;  %2826 = vmatpush3.bf16.msra.mxu1 %v2969_v37 }
 0x201   : > { %v1394_v52 = vsel %vm1380_vm3, %v1377_v41, %v1325_v57  ;;  %2827 = vmatprep.subr.bf16.mxu1 %v2970_v25 }
 0x202   : > { %v1569_v47 = vadd.f32 %v1553_v51, %v1394_v52  ;;  %v1327_v22 = vpop.permute.xlu0 %1326 }
 0x203   : > { %v1395_v2 = vsel %vm1380_vm3, %v1378_v9, %v1327_v22  ;;  %v2978_v9 = vld [vmem:[%s3139_s13 + $0x28] sm:$0xff]  }
 0x204   : > { %v1570_v10 = vadd.f32 %v1554_v55, %v1395_v2  ;;  %v1329_v14 = vpop.permute.xlu1 %1328  ;;  %v1578_v48 = vpack.c.bf16 %v1569_v47, %v1568_v27  ;;  %2828 = vmatpush3.bf16.msra.mxu1 %v2970_v25  ;;  %v2977_v27 = vld [vmem:[%s3139_s13 + $0x20] sm:$0xff]  }
 0x205   : > { %v1396_v60 = vsel %vm1380_vm3, %v1379_v34, %v1329_v14  ;;  %2829 = vmatprep.subr.bf16.mxu1 %v2971_v38 }
 0x206   : > { %v1571_v21 = vadd.f32 %v1555_v53, %v1396_v60  ;;  %2813 = vmatprep.mubr.bf16.mxu1 %v1578_v48 }
 0x208   : > { %v1579_v62 = vpack.c.bf16 %v1571_v21, %v1570_v10  ;;  %2830 = vmatpush3.bf16.msra.mxu1 %v2971_v38 }
 0x209   : > { %2831 = vmatprep.subr.bf16.mxu1 %v2972_v11 }
 0x20a   : > { %2814 = vmatmul.mubr.bf16.gmra.mrb[12].mxu1 %v1579_v62 }
 0x20c   : > { %2832 = vmatpush3.bf16.msra.mxu1 %v2972_v11  ;;  %v2979_v11 = vld [vmem:[%s3139_s13 + $0x30] sm:$0xff]  }
 0x20d   : > { %2849 = vmatprep.subr.bf16.mxu1 %v2973_v3 }
 0x2c2   : > { %v2803_v54 = vpop.f32.mrb[0].mxu1 }
 0x2c3   : > { %v1694_v61 = vadd.f32 %v2803_v54, %v3661_v56  ;;  %v1685_v15 = vpop.f32.mrb[1].mxu1 }
 0x2c4   : > { %v1686_v43 = vadd.f32 %v3661_v56, %v1685_v15  ;;  %v2804_v23 = vpop.f32.mrb[2].mxu1 }
 0x2c5   : > { %v1697_v13 = vadd.f32 %v2804_v23, %v3661_v56  ;;  %v1688_v36 = vpop.f32.mrb[3].mxu1  ;;  %v1750_v12 = vmax.f32 %v1694_v61, 0.0 }
 0x2c6   : > { %v1689_v39 = vadd.f32 %v3661_v56, %v1688_v36  ;;  %v1748_v24 = vmax.f32 %v1686_v43, 0.0 }
 0x2c7   : > { %v1751_v49 = vmax.f32 %v1697_v13, 0.0 }
 0x2c8   : > { %v1749_v4 = vmax.f32 %v1689_v39, 0.0 }
 0x2c9   : > { %v1765_v16 = vpack.c.bf16 %v1751_v49, %v1750_v12 }
 0x2ca   : > { %v1764_v17 = vpack.c.bf16 %v1749_v4, %v1748_v24  ;;  %v2807_v42 = vpop.f32.mrb[4].mxu1 }
 0x2cb   : > { %v1710_v29 = vadd.f32 %v2807_v42, %v3661_v56  ;;  %v1701_v58 = vpop.f32.mrb[5].mxu1 }
 0x2cc   : > { %v1702_v26 = vadd.f32 %v3661_v56, %v1701_v58  ;;  %v2808_v44 = vpop.f32.mrb[6].mxu1  ;;  %2833 = vmatprep.mubr.bf16.mxu1 %v1764_v17 }
 0x2cd   : > { %v1713_v37 = vadd.f32 %v2808_v44, %v3661_v56  ;;  %v1704_v63 = vpop.f32.mrb[7].mxu1  ;;  %2834 = vmatmul.mubr.bf16.vlgmr.msra.gmra.mrb[16].mxu1 %v1765_v16  ;;  %v1754_v40 = vmax.f32 %v1710_v29, 0.0 }
 0x2ce   : > { %v1705_v28 = vadd.f32 %v3661_v56, %v1704_v63  ;;  %2850 = vmatpush3.bf16.msra.mxu1 %v2973_v3  ;;  %v1752_v50 = vmax.f32 %v1702_v26, 0.0  ;;  %v2980_v3 = vld [vmem:[%s3139_s13 + $0x38] sm:$0xff]  }
 0x2cf   : > { %v1755_v18 = vmax.f32 %v1713_v37, 0.0  ;;  %2851 = vmatprep.subr.bf16.mxu1 %v2974_v6 }
 0x2d0   : > { %v1753_v19 = vmax.f32 %v1705_v28, 0.0 }
 0x2d1   : > { %v1767_v59 = vpack.c.bf16 %v1755_v18, %v1754_v40 }
 0x2d2   : > { %v1766_v25 = vpack.c.bf16 %v1753_v19, %v1752_v50  ;;  %v2811_v45 = vpop.f32.mrb[8].mxu1  ;;  %2852 = vmatpush3.bf16.msra.mxu1 %v2974_v6 }
 0x2d3   : > { %v1726_v20 = vadd.f32 %v2811_v45, %v3661_v56  ;;  %v1717_v7 = vpop.f32.mrb[9].mxu1  ;;  %2853 = vmatprep.subr.bf16.mxu1 %v2975_v5 }
 0x2d4   : > { %v1718_v32 = vadd.f32 %v3661_v56, %v1717_v7  ;;  %v2812_v35 = vpop.f32.mrb[10].mxu1  ;;  %2837 = vmatprep.mubr.bf16.mxu1 %v1766_v25 }
 0x2d5   : > { %v1729_v0 = vadd.f32 %v2812_v35, %v3661_v56  ;;  %v1720_v8 = vpop.f32.mrb[11].mxu1  ;;  %2838 = vmatmul.mubr.bf16.gmra.mrb[20].mxu1 %v1767_v59  ;;  %v1758_v31 = vmax.f32 %v1726_v20, 0.0 }
 0x2d6   : > { %v1721_v46 = vadd.f32 %v3661_v56, %v1720_v8  ;;  %2854 = vmatpush3.bf16.msra.mxu1 %v2975_v5  ;;  %v1756_v51 = vmax.f32 %v1718_v32, 0.0 }
 0x2d7   : > { %v1759_v41 = vmax.f32 %v1729_v0, 0.0  ;;  %2855 = vmatprep.subr.bf16.mxu1 %v2976_v1 }
 0x2d8   : > { %v1757_v57 = vmax.f32 %v1721_v46, 0.0 }
 0x2d9   : > { %v1769_v52 = vpack.c.bf16 %v1759_v41, %v1758_v31 }
 0x2da   : > { %v1768_v30 = vpack.c.bf16 %v1757_v57, %v1756_v51  ;;  %2856 = vmatpush3.bf16.msra.mxu1 %v2976_v1 }
 0x2db   : > { %2857 = vmatprep.subr.bf16.mxu1 %v2977_v27 }
 0x2dc   : > { %2841 = vmatprep.mubr.bf16.mxu1 %v1768_v30 }
 0x2dd   : > { %v2815_v47 = vpop.f32.mrb[12].mxu1  ;;  %2842 = vmatmul.mubr.bf16.gmra.mrb[24].mxu1 %v1769_v52 }
 0x2de   : > { %v1742_v55 = vadd.f32 %v2815_v47, %v3661_v56  ;;  %v1733_v22 = vpop.f32.mrb[13].mxu1  ;;  %2858 = vmatpush3.bf16.msra.mxu1 %v2977_v27 }
 0x2df   : > { %v1734_v2 = vadd.f32 %v3661_v56, %v1733_v22  ;;  %v2816_v33 = vpop.f32.mrb[14].mxu1  ;;  %2859 = vmatprep.subr.bf16.mxu1 %v2978_v9 }
 0x2e0   : > { %v1745_v34 = vadd.f32 %v2816_v33, %v3661_v56  ;;  %v1736_v10 = vpop.f32.mrb[15].mxu1  ;;  %v1762_v14 = vmax.f32 %v1742_v55, 0.0 }
 0x2e1   : > { %v1737_v53 = vadd.f32 %v3661_v56, %v1736_v10  ;;  %v1760_v60 = vmax.f32 %v1734_v2, 0.0  ;;  %v2579_v56 = vld [vmem:[%s3848_s29] ss:$0 sm:$0xff] }
 0x2e2   : > { %v1763_v48 = vmax.f32 %v1745_v34, 0.0  ;;  %2860 = vmatpush3.bf16.msra.mxu1 %v2978_v9 }
 0x2e3   : > { %v1761_v21 = vmax.f32 %v1737_v53, 0.0  ;;  %2861 = vmatprep.subr.bf16.mxu1 %v2979_v11 }
 0x2e4   : > { %v1771_v62 = vpack.c.bf16 %v1763_v48, %v1762_v14  ;;  %v2588_v48 = vld [vmem:[%s3849_s16] ss:$0 sm:$0xff] }
 0x2e5   : > { %v1770_v38 = vpack.c.bf16 %v1761_v21, %v1760_v60 }
 0x2e6   : > { %2862 = vmatpush3.bf16.msra.mxu1 %v2979_v11 }
 0x2e7   : > { %2845 = vmatprep.mubr.bf16.mxu1 %v1770_v38  ;;  %2863 = vmatprep.subr.bf16.mxu1 %v2980_v3 }
 0x2e8   : > { %2846 = vmatmul.mubr.bf16.gmra.mrb[28].mxu1 %v1771_v62 }
 0x2ea   : > { %2864 = vmatpush3.bf16.msra.mxu1 %v2980_v3 }
 0x3a0   : > { %v2835_v54 = vpop.f32.mrb[16].mxu1 }
 0x3a1   : > { %v1886_v61 = vadd.f32 %v2835_v54, %v2579_v56  ;;  %v1877_v15 = vpop.f32.mrb[17].mxu1 }
 0x3a2   : > { %v1878_v43 = vadd.f32 %v2579_v56, %v1877_v15  ;;  %v2836_v23 = vpop.f32.mrb[18].mxu1 }
 0x3a3   : > { %v1889_v13 = vadd.f32 %v2836_v23, %v2579_v56  ;;  %v1880_v36 = vpop.f32.mrb[19].mxu1  ;;  %v1942_v12 = vmax.f32 %v1886_v61, 0.0 }
 0x3a4   : > { %v1881_v39 = vadd.f32 %v2579_v56, %v1880_v36  ;;  %v1940_v24 = vmax.f32 %v1878_v43, 0.0 }
 0x3a5   : > { %v1943_v49 = vmax.f32 %v1889_v13, 0.0 }
 0x3a6   : > { %v1941_v4 = vmax.f32 %v1881_v39, 0.0 }
 0x3a7   : > { %v1957_v16 = vpack.c.bf16 %v1943_v49, %v1942_v12 }
 0x3a8   : > { %v1956_v17 = vpack.c.bf16 %v1941_v4, %v1940_v24  ;;  %v2839_v42 = vpop.f32.mrb[20].mxu1 }
 0x3a9   : > { %v1902_v29 = vadd.f32 %v2839_v42, %v2579_v56  ;;  %v1893_v58 = vpop.f32.mrb[21].mxu1 }
 0x3aa   : > { %v1894_v6 = vadd.f32 %v2579_v56, %v1893_v58  ;;  %v2840_v26 = vpop.f32.mrb[22].mxu1  ;;  %2865 = vmatprep.mubr.bf16.mxu1 %v1956_v17 }
 0x3ab   : > { %v1905_v44 = vadd.f32 %v2840_v26, %v2579_v56  ;;  %v1896_v37 = vpop.f32.mrb[23].mxu1  ;;  %2866 = vmatmul.mubr.bf16.vlgmr.msra.gmra.mrb[32].mxu1 %v1957_v16  ;;  %v1946_v28 = vmax.f32 %v1902_v29, 0.0 }
 0x3ac   : > { %v1897_v63 = vadd.f32 %v2579_v56, %v1896_v37  ;;  %v1944_v18 = vmax.f32 %v1894_v6, 0.0 }
 0x3ad   : > { %v1947_v40 = vmax.f32 %v1905_v44, 0.0 }
 0x3ae   : > { %v1945_v5 = vmax.f32 %v1897_v63, 0.0 }
 0x3af   : > { %v1959_v50 = vpack.c.bf16 %v1947_v40, %v1946_v28 }
 0x3b0   : > { %v1958_v19 = vpack.c.bf16 %v1945_v5, %v1944_v18  ;;  %v2843_v59 = vpop.f32.mrb[24].mxu1 }
 0x3b1   : > { %v1918_v25 = vadd.f32 %v2843_v59, %v2579_v56  ;;  %v1909_v45 = vpop.f32.mrb[25].mxu1 }
 0x3b2   : > { %v1910_v20 = vadd.f32 %v2579_v56, %v1909_v45  ;;  %v2844_v7 = vpop.f32.mrb[26].mxu1  ;;  %2869 = vmatprep.mubr.bf16.mxu1 %v1958_v19 }
 0x3b3   : > { %v1921_v1 = vadd.f32 %v2844_v7, %v2579_v56  ;;  %v1912_v32 = vpop.f32.mrb[27].mxu1  ;;  %2870 = vmatmul.mubr.bf16.gmra.mrb[36].mxu1 %v1959_v50  ;;  %v1950_v0 = vmax.f32 %v1918_v25, 0.0 }
 0x3b4   : > { %v1913_v35 = vadd.f32 %v2579_v56, %v1912_v32  ;;  %v1948_v46 = vmax.f32 %v1910_v20, 0.0 }
 0x3b5   : > { %v1951_v8 = vmax.f32 %v1921_v1, 0.0 }
 0x3b6   : > { %v1949_v31 = vmax.f32 %v1913_v35, 0.0 }
 0x3b7   : > { %v1961_v41 = vpack.c.bf16 %v1951_v8, %v1950_v0 }
 0x3b8   : > { %v1960_v27 = vpack.c.bf16 %v1949_v31, %v1948_v46 }
 0x3ba   : > { %2873 = vmatprep.mubr.bf16.mxu1 %v1960_v27 }
 0x3bb   : > { %v2847_v51 = vpop.f32.mrb[28].mxu1  ;;  %2874 = vmatmul.mubr.bf16.gmra.mrb[40].mxu1 %v1961_v41 }
 0x3bc   : > { %v1934_v57 = vadd.f32 %v2847_v51, %v2579_v56  ;;  %v1925_v52 = vpop.f32.mrb[29].mxu1 }
 0x3bd   : > { %v1926_v30 = vadd.f32 %v2579_v56, %v1925_v52  ;;  %v2848_v9 = vpop.f32.mrb[30].mxu1 }
 0x3be   : > { %v1937_v47 = vadd.f32 %v2848_v9, %v2579_v56  ;;  %v1928_v55 = vpop.f32.mrb[31].mxu1  ;;  %v1954_v2 = vmax.f32 %v1934_v57, 0.0 }
 0x3bf   : > { %v1929_v22 = vadd.f32 %v2579_v56, %v1928_v55  ;;  %v1952_v34 = vmax.f32 %v1926_v30, 0.0 }
 0x3c0   : > { %v1955_v33 = vmax.f32 %v1937_v47, 0.0 }
 0x3c1   : > { %v1953_v10 = vmax.f32 %v1929_v22, 0.0  ;;  %v2981_v22 = vld [vmem:[%s3826_s9] sm:$0xff] (!%p2597_p5)  }
 0x3c2   : > { %v1963_v53 = vpack.c.bf16 %v1955_v33, %v1954_v2  ;;  %v3026_v2 = vmov (!%p2597_p5), 0.0   ;;  %v2982_v33 = vld [vmem:[%s3826_s9 + $0x8] sm:$0xff] (!%p2597_p5)  }
 0x3c3   : > { %v1962_v14 = vpack.c.bf16 %v1953_v10, %v1952_v34  ;;  %2881 = vmatprep.subr.bf16.mxu0 (!%p2597_p5), %v3026_v2  ;;  %2889 = vmatprep.subr.bf16.mxu1 (!%p2597_p5), %v3026_v2 }
 0x3c4   : > { %2882 = vmatpush3.bf16.msra.mxu0 (!%p2597_p5), %v2981_v22  ;;  %2885 = vmatprep.mubr.msk.bf16.mxu0 (!%p2597_p5), %vm3027_vm4, %v3026_v2  ;;  %v2354_v22 = vld [vmem:[%s3829_s12] sm:$0x1] (!%p2597_p5) }
 0x3c5   : > { %2877 = vmatprep.mubr.bf16.mxu1 %v1962_v14  ;;  %2883 = vmatprep.subr.bf16.mxu0 (!%p2597_p5), %v3026_v2 }
 0x3c6   : > { %2878 = vmatmul.mubr.bf16.gmra.mrb[44].mxu1 %v1963_v53 }
 0x3c7   : > { %2893 = vmatprep.mubr.msk.bf16.mxu1 (!%p2597_p5), %vm3027_vm4, %v3026_v2 }
 0x3c8   : > { %2884 = vmatpush3.bf16.msra.mxu0 (!%p2597_p5), %v2982_v33 }
 0x47e   : > { %v2867_v60 = vpop.f32.mrb[32].mxu1 }
 0x47f   : > { %v3696_v21 = vadd.f32 %v2867_v60, %v2588_v48  ;;  %v2069_v62 = vpop.f32.mrb[33].mxu1 }
 0x480   : > { %v3698_v38 = vadd.f32 %v2588_v48, %v2069_v62  ;;  %v2868_v11 = vpop.f32.mrb[34].mxu1 }
 0x481   : > { %v3700_v3 = vadd.f32 %v2868_v11, %v2588_v48  ;;  %v2072_v56 = vpop.f32.mrb[35].mxu1  ;;  %v2134_v61 = vmax.f32 %v3696_v21, 0.0 }
 0x482   : > { %v3702_v54 = vadd.f32 %v2588_v48, %v2072_v56  ;;  %v2132_v43 = vmax.f32 %v3698_v38, 0.0 }
 0x483   : > { %v2135_v15 = vmax.f32 %v3700_v3, 0.0  ;;  %v2252_v14 = vsel (!%p2597_p5), %vm1346_vm1, %v2134_v61, 0.0 }
 0x484   : > { %v2133_v23 = vmax.f32 %v3702_v54, 0.0  ;;  %v2249_v10 = vsel (!%p2597_p5), %vm1346_vm1, %v2132_v43, 0.0 }
 0x485   : > { %v2149_v13 = vpack.c.bf16 %v2135_v15, %v2134_v61  ;;  %v2254_v62 = vsel (!%p2597_p5), %vm1346_vm1, %v2135_v15, 0.0 }
 0x486   : > { %v2148_v36 = vpack.c.bf16 %v2133_v23, %v2132_v43  ;;  %v2871_v39 = vpop.f32.mrb[36].mxu1  ;;  %v2250_v53 = vsel (!%p2597_p5), %vm1346_vm1, %v2133_v23, 0.0 }
 0x487   : > { %2157 = vst.msk [vmem:[#allocation2 + $0x8] sm:$0xff] %vm1346_vm1, %v2149_v13  ;;  %v3717_v12 = vadd.f32 %v2871_v39, %v2588_v48  ;;  %v2085_v49 = vpop.f32.mrb[37].mxu1 }
 0x488   : > { %2156 = vst.msk [vmem:[#allocation2] sm:$0xff] %vm1346_vm1, %v2148_v36  ;;  %v2086_v24 = vadd.f32 %v2588_v48, %v2085_v49  ;;  %v2872_v4 = vpop.f32.mrb[38].mxu1 }
 0x489   : > { %v3720_v16 = vadd.f32 %v2872_v4, %v2588_v48  ;;  %v2088_v17 = vpop.f32.mrb[39].mxu1  ;;  %v2138_v29 = vmax.f32 %v3717_v12, 0.0 }
 0x48a   : > { %v2089_v42 = vadd.f32 %v2588_v48, %v2088_v17  ;;  %v2136_v6 = vmax.f32 %v2086_v24, 0.0 }
 0x48b   : > { %v2139_v58 = vmax.f32 %v3720_v16, 0.0  ;;  %v2239_v56 = vmul.f32 (!%p2597_p5), 0.0, %v2138_v29 }
 0x48c   : > { %v2137_v26 = vmax.f32 %v2089_v42, 0.0  ;;  %v2237_v34 = vmul.f32 (!%p2597_p5), 0.0, %v2136_v6 }
 0x48d   : > { %v2151_v44 = vpack.c.bf16 %v2139_v58, %v2138_v29  ;;  %v2240_v54 = vmul.f32 (!%p2597_p5), 0.0, %v2139_v58  ;;  %v2260_v61 = vsel (!%p2597_p5), %vm1346_vm1, %v2239_v56, 0.0 }
 0x48e   : > { %v2150_v37 = vpack.c.bf16 %v2137_v26, %v2136_v6  ;;  %v2875_v63 = vpop.f32.mrb[40].mxu1  ;;  %v2238_v60 = vmul.f32 (!%p2597_p5), 0.0, %v2137_v26  ;;  %v2256_v38 = vsel (!%p2597_p5), %vm1346_vm1, %v2237_v34, 0.0 }
 0x48f   : > { %2159 = vst.msk [vmem:[#allocation2 + $0x18] sm:$0xff] %vm1346_vm1, %v2151_v44  ;;  %v3727_v28 = vadd.f32 %v2875_v63, %v2588_v48  ;;  %v2101_v40 = vpop.f32.mrb[41].mxu1  ;;  %v2262_v3 = vsel (!%p2597_p5), %vm1346_vm1, %v2240_v54, 0.0 }
 0x490   : > { %2158 = vst.msk [vmem:[#allocation2 + $0x10] sm:$0xff] %vm1346_vm1, %v2150_v37  ;;  %v2102_v18 = vadd.f32 %v2588_v48, %v2101_v40  ;;  %v2876_v5 = vpop.f32.mrb[42].mxu1  ;;  %v2258_v23 = vsel (!%p2597_p5), %vm1346_vm1, %v2238_v60, 0.0 }
 0x491   : > { %v3730_v50 = vadd.f32 %v2876_v5, %v2588_v48  ;;  %v2104_v19 = vpop.f32.mrb[43].mxu1  ;;  %v2142_v25 = vmax.f32 %v3727_v28, 0.0 }
 0x492   : > { %v2105_v59 = vadd.f32 %v2588_v48, %v2104_v19  ;;  %v2140_v20 = vmax.f32 %v2102_v18, 0.0 }
 0x493   : > { %v2143_v45 = vmax.f32 %v3730_v50, 0.0  ;;  %v2243_v15 = vmul.f32 (!%p2597_p5), 0.0, %v2142_v25 }
 0x494   : > { %v2141_v7 = vmax.f32 %v2105_v59, 0.0  ;;  %v2241_v13 = vmul.f32 (!%p2597_p5), 0.0, %v2140_v20 }
 0x495   : > { %v2153_v1 = vpack.c.bf16 %v2143_v45, %v2142_v25  ;;  %v2244_v4 = vmul.f32 (!%p2597_p5), 0.0, %v2143_v45  ;;  %v2268_v29 = vsel (!%p2597_p5), %vm1346_vm1, %v2243_v15, 0.0 }
 0x496   : > { %v2152_v32 = vpack.c.bf16 %v2141_v7, %v2140_v20  ;;  %v2242_v39 = vmul.f32 (!%p2597_p5), 0.0, %v2141_v7  ;;  %v2264_v49 = vsel (!%p2597_p5), %vm1346_vm1, %v2241_v13, 0.0 }
 0x497   : > { %2161 = vst.msk [vmem:[#allocation2 + $0x28] sm:$0xff] %vm1346_vm1, %v2153_v1  ;;  %v2270_v26 = vsel (!%p2597_p5), %vm1346_vm1, %v2244_v4, 0.0 }
 0x498   : > { %2160 = vst.msk [vmem:[#allocation2 + $0x20] sm:$0xff] %vm1346_vm1, %v2152_v32  ;;  %v2266_v17 = vsel (!%p2597_p5), %vm1346_vm1, %v2242_v39, 0.0 }
 0x499   : > { %v2879_v35 = vpop.f32.mrb[44].mxu1 }
 0x49a   : > { %v2126_v0 = vadd.f32 %v2879_v35, %v2588_v48  ;;  %v2117_v8 = vpop.f32.mrb[45].mxu1 }
 0x49b   : > { %v2118_v46 = vadd.f32 %v2588_v48, %v2117_v8  ;;  %v2880_v31 = vpop.f32.mrb[46].mxu1 }
 0x49c   : > { %v2129_v41 = vadd.f32 %v2880_v31, %v2588_v48  ;;  %v2120_v27 = vpop.f32.mrb[47].mxu1  ;;  %v2146_v57 = vmax.f32 %v2126_v0, 0.0  ;;  %v2983_v31 = vld [vmem:[%s3828_s11] sm:$0xff] (!%p2597_p5)  }
 0x49d   : > { %v2121_v51 = vadd.f32 %v2588_v48, %v2120_v27  ;;  %v2144_v30 = vmax.f32 %v2118_v46, 0.0  ;;  %2167 = sbr.rel (%p2597_p5) target bundleno = 1660 (0x67c), region = 80  ;;  %v2251_v48 = vadd.f32 (!%p2597_p5), %v2250_v53, %v2249_v10  ;;  %2890 = vmatpush3.bf16.msra.mxu1 (!%p2597_p5), %v2983_v31  ;;  %v2292_v27 = vld [vmem:[%s3827_s10] sm:$0x1] (!%p2597_p5) }
 0x49e   : > { %v2147_v52 = vmax.f32 %v2129_v41, 0.0  ;;  %v2247_v37 = vmul.f32 (!%p2597_p5), 0.0, %v2146_v57  ;;  %2891 = vmatprep.subr.bf16.mxu1 (!%p2597_p5), %v3026_v2  ;;  %v2984_v41 = vld [vmem:[%s3828_s11 + $0x8] sm:$0xff] (!%p2597_p5)  }
 0x49f   : > { %v2145_v9 = vmax.f32 %v2121_v51, 0.0  ;;  %v2253_v11 = vadd.f32 (!%p2597_p5), %v2252_v14, %v2251_v48  ;;  %v2245_v42 = vmul.f32 (!%p2597_p5), 0.0, %v2144_v30 }
 0x4a0   : > { %v2155_v47 = vpack.c.bf16 %v2147_v52, %v2146_v57  ;;  %v2248_v40 = vmul.f32 (!%p2597_p5), 0.0, %v2147_v52  ;;  %v2276_v50 = vsel (!%p2597_p5), %vm1346_vm1, %v2247_v37, 0.0 }
 0x4a1   : > { %v2154_v55 = vpack.c.bf16 %v2145_v9, %v2144_v30  ;;  %v2255_v43 = vadd.f32 (!%p2597_p5), %v2254_v62, %v2253_v11  ;;  %v2246_v6 = vmul.f32 (!%p2597_p5), 0.0, %v2145_v9  ;;  %v2272_v63 = vsel (!%p2597_p5), %vm1346_vm1, %v2245_v42, 0.0  ;;  %2892 = vmatpush3.bf16.msra.mxu1 (!%p2597_p5), %v2984_v41 }
 0x4a2   : > { %2163 = vst.msk [vmem:[#allocation2 + $0x38] sm:$0xff] %vm1346_vm1, %v2155_v47  ;;  %v2278_v59 = vsel (!%p2597_p5), %vm1346_vm1, %v2248_v40, 0.0 }
 0x4a3   : > { %2162 = vst.msk [vmem:[#allocation2 + $0x30] sm:$0xff] %vm1346_vm1, %v2154_v55  ;;  %v2257_v21 = vadd.f32 (!%p2597_p5), %v2256_v38, %v2255_v43  ;;  %v2274_v18 = vsel (!%p2597_p5), %vm1346_vm1, %v2246_v6, 0.0 }
 0x4a5   : > { %v2259_v36 = vadd.f32 %v2258_v23, %v2257_v21 }
 0x4a7   : > { %v2261_v12 = vadd.f32 %v2260_v61, %v2259_v36 }
 0x4a9   : > { %v2263_v24 = vadd.f32 %v2262_v3, %v2261_v12 }
 0x4ab   : > { %v2265_v16 = vadd.f32 %v2264_v49, %v2263_v24 }
 0x4ad   : > { %v2267_v58 = vadd.f32 %v2266_v17, %v2265_v16 }
 0x4af   : > { %v2269_v44 = vadd.f32 %v2268_v29, %v2267_v58 }
 0x4b1   : > { %v2271_v28 = vadd.f32 %v2270_v26, %v2269_v44 }
 0x4b3   : > { %v2273_v5 = vadd.f32 %v2272_v63, %v2271_v28 }
 0x4b5   : > { %v2275_v19 = vadd.f32 %v2274_v18, %v2273_v5 }
 0x4b7   : > { %v2277_v25 = vadd.f32 %v2276_v50, %v2275_v19 }
 0x4b9   : > { %v2279_v45 = vadd.f32 %v2278_v59, %v2277_v25 }
 0x4bb   : > { %v2280_v20 = vrot.slane %v2279_v45, 4 }
 0x4bd   : > { %v2281_v7 = vadd.f32 %v2280_v20, %v2279_v45 }
 0x4bf   : > { %v2282_v1 = vrot.slane %v2281_v7, 2 }
 0x4c1   : > { %v2283_v32 = vadd.f32 %v2282_v1, %v2281_v7 }
 0x4c3   : > { %v2284_v35 = vrot.slane %v2283_v32, 1 }
 0x4c5   : > { %v2285_v0 = vadd.f32 %v2284_v35, %v2283_v32 }
 0x4c7   : > { %v2286_v8 = vmul.f32 0.03125, %v2285_v0 }
 0x4c9   : > { %v2287_v46 = vpack.c.bf16 %v2286_v8, %v2286_v8 }
 0x4cb   : > { %2886 = vmatmul.mubr.msk.bf16.vlgmr.msra.gmra.mrb[0].mxu0 %vm1346_vm1, %v2287_v46 }
 0x59e   : > { %v2342_v51 = vpop.f32.mrb[0].mxu0 }
 0x59f   : > { %v2343_v57 = vadd.f32 %v2342_v51, %v2292_v27  ;;  %v2887_v52 = vpop.f32.mrb[1].mxu0 }
 0x5a0   : > { %v2345_v30 = vpop.f32.mrb[2].mxu0 }
 0x5a1   : > { %v2348_v9 = vmax.f32 %v2343_v57, 0.0  ;;  %v2888_v47 = vpop.f32.mrb[3].mxu0 }
 0x5a3   : > { %v2349_v55 = vpack.c.bf16 %v2348_v9, %v2348_v9 }
 0x5a5   : > { %2894 = vmatmul.mubr.msk.bf16.vlgmr.msra.gmra.mrb[0].mxu1 %vm1346_vm1, %v2349_v55 }
 0x678   : > { %v2404_v2 = vpop.f32.mrb[0].mxu1 }
 0x679   : > { %v2405_v33 = vadd.f32 %v2404_v2, %v2354_v22  ;;  %v2895_v34 = vpop.f32.mrb[1].mxu1 }
 0x67a   : > { %v2407_v10 = vpop.f32.mrb[2].mxu1 }
 0x67b   : > { %2411 = vst.msk [vmem:[#allocation3] sm:$0x1] %vm2410_vm5, %v2405_v33  ;;  %v2896_v53 = vpop.f32.mrb[3].mxu1 }
 0x67c PF: > { %p2901_p6 = scmp.eq.s32.totalorder %s3105_s26, 1  ;;  %s3028_s20 = smov [#allocation3]  }
 0x67d   : > { %s2419_s23 = sshll.u32 %s3028_s20, 4  ;;  %s2420_s23 = int_to_ptr.vmem [resolvable:$true] %s2419_s23 }
 0x67e   : > { %s2985_s29 = scalar_lea.vmem %s2420_s23, 16  ;;  %s2991_s13 = scalar_lea.vmem %s2420_s23, 32 }
 0x67f   : > { %p2986_p7 = scmp.ne.s32.totalorder %s2420_s23, %s2985_s29  ;;  %p2992_p10 = scmp.lt.s32.totalorder %s2420_s23, %s2420_s23 }
 0x680   : > { %p2993_p11 = scmp.lt.s32.totalorder %s2991_s13, %s2985_s29 }
 0x681   : > { %p2987_p8 = pnand %p2986_p7, %p2901_p6 }
 0x682   : > { %p2994_p12 = por %p2993_p11, %p2992_p10 }
 0x683   : > { %p2988_p9 = pneg %p2987_p8 }
 0x685   : > { %p2995_p13 = pnand %p2994_p12, %p2988_p9 }
 0x687   : > { %2998 = shalt.err (!%p2995_p13)
}
 0x688   : > { %s3850_s27 = sld [smem:[#allocation13_spill]] }
 0x68e   : > { %s2999_s18 = scalar_lea.hbm %s3850_s27, 16 }
 0x68f   : > { %p3000_p0 = scmp.ne.s32.totalorder %s3850_s27, %s2999_s18  ;;  %p3005_p3 = scmp.lt.u32.totalorder %s2999_s18, %s3850_s27 }
 0x691   : > { %p3001_p1 = pnand %p3000_p0, %p2901_p6 }
 0x693   : > { %p3002_p2 = pneg %p3001_p1 }
 0x695   : > { %p3007_p4 = pnand %p3005_p3, %p3002_p2 }
 0x697   : > { %3010 = shalt.err (!%p3007_p4)
}
 0x698   : > { %2898 = dma.vmem_to_hbm [thread:$0]  (%p2901_p6), %s2420_s23, 16, %s3850_s27, [#allocation4]  }
 0x699   : > { %3016 = dma.done.wait (%p2901_p6), [#allocation4], 16  }
 0x69a   : > { %3018 = vsyncadd (%p2901_p6), [#allocation4], 4294967280 }
 0x69b PF: > { %s3851_s24 = sld [smem:[#allocation6_spill]] }
 0x6a1   : > { %s24_s25 = sadd.s32 1, %s3851_s24  }
 0x6a2   : > { %p21_p5 = scmp.ge.s32.totalorder %s24_s25, 4  }
 0x6a4   :  { %23 = sbr.rel (!%p21_p5) target bundleno = 4 (0x4), region = 125 }
 0x6ab   :  { %2432 = vsyncpa [#allocation4], 1 }
 0x6ac   :  { %2434 = vsyncpa [#allocation4 + $0x1], 1 }

</bundles_post_ra>
